<compile_context>
chip_gen: v7x
topology: tpu7x:2x2x1
jax: 0.10.0
libtpu: 0.0.40
codegen_flags: <defaults>
</compile_context>

<pallas_src>
import functools

import jax
import jax.numpy as jnp
import numpy as np
from jax.experimental import pallas as pl
from jax.experimental.pallas import tpu as pltpu


def _deep_rfm_kernel(x_ref, w_top_ref, w_bot_ref, b_ref, w_out_ref, out_ref,
                     *, B, D_r):
    """One N row-tile; the full B-map recurrence runs in-kernel.

    x_ref     : (TN, D)        bf16   row tile of the input
    w_top_ref : (D, B*D_r)     bf16   [Wtop_0 | ... | Wtop_{B-1}]  (x path)
    w_bot_ref : (B, D, D_r)    bf16   Wbot_i = W_in[:, :, D:]^T    (z path)
    b_ref     : (1, B*D_r)     f32    biases, flattened to match w_top columns
    w_out_ref : (B, D_r, D)    bf16   W_out^T
    out_ref   : (TN, D)        f32
    """
    x = x_ref[...]                                   # bf16 (TN, D)

    # x-path + bias for ALL maps in ONE fused MXU matmul (off the serial
    # dependence chain):  xwb[:, i*D_r:(i+1)*D_r] = x @ Wtop_i + b_i
    xwb = jnp.dot(x, w_top_ref[...], preferred_element_type=jnp.float32)
    xwb = xwb + b_ref[...]                           # (TN, B*D_r) f32

    z = x                                            # z_0 = x (bf16 operand)
    z_f32 = x.astype(jnp.float32)                    # result if B == 0
    # B is a (small) static hyper-parameter -> unrolled loop, no dynamic
    # weight indexing; per step only {matmul, add, tanh, matmul} on the chain.
    for i in range(B):
        s = xwb[:, i * D_r:(i + 1) * D_r] + jnp.dot(
            z, w_bot_ref[i], preferred_element_type=jnp.float32)
        h = jnp.tanh(s)                              # EUP, f32
        z_f32 = jnp.dot(h.astype(jnp.bfloat16), w_out_ref[i],
                        preferred_element_type=jnp.float32)
        z = z_f32.astype(jnp.bfloat16)               # next-step matmul operand

    out_ref[...] = z_f32.astype(out_ref.dtype)       # last step's f32 result


def deep_rfm_forward(x, w_in, b_in, w_out, block_n=128):
    """
    x     : (N, D)          float32
    w_in  : (B, D_r, 2D)    PyTorch Linear weight layout (out_features, in_features)
    b_in  : (B, D_r)
    w_out : (B, D, D_r)     PyTorch Linear weight layout, no bias
    returns (N, D) float32
    """
    N, D = x.shape
    B, D_r, twoD = w_in.shape
    assert twoD == 2 * D
    assert w_out.shape == (B, D, D_r)
    assert b_in.shape == (B, D_r)

    # --- parameter prep (one-time; fold into parameter storage in real use) ---
    w_top = jnp.transpose(w_in[:, :, :D], (0, 2, 1))                   # (B, D, D_r)
    w_top_cat = (jnp.transpose(w_top, (1, 0, 2))                       # (D, B, D_r)
                 .reshape(D, B * D_r).astype(jnp.bfloat16))            # (D, B*D_r)
    w_bot = jnp.transpose(w_in[:, :, D:], (0, 2, 1)).astype(jnp.bfloat16)   # (B, D, D_r)
    w_out_t = jnp.transpose(w_out, (0, 2, 1)).astype(jnp.bfloat16)          # (B, D_r, D)
    b_flat = b_in.reshape(1, B * D_r).astype(jnp.float32)                   # (1, B*D_r)

    x_bf = x.astype(jnp.bfloat16)

    # --- N tiling (the only grid axis; rows are independent -> "parallel") ---
    tn = min(block_n, N)
    n_pad = (-N) % tn
    if n_pad:
        x_bf = jnp.pad(x_bf, ((0, n_pad), (0, 0)))
    n_padded = N + n_pad

    grid_spec = pltpu.PrefetchScalarGridSpec(
        num_scalar_prefetch=0,
        grid=(n_padded // tn,),
        in_specs=[
            pl.BlockSpec((tn, D), lambda i: (i, 0)),           # x row tile
            pl.BlockSpec((D, B * D_r), lambda i: (0, 0)),      # fused x-path weights
            pl.BlockSpec((B, D, D_r), lambda i: (0, 0, 0)),    # z-path weight stack
            pl.BlockSpec((1, B * D_r), lambda i: (0, 0)),      # biases (flattened)
            pl.BlockSpec((B, D_r, D), lambda i: (0, 0, 0)),    # output weight stack
        ],
        out_specs=pl.BlockSpec((tn, D), lambda i: (i, 0)),
    )

    out = pl.pallas_call(
        functools.partial(_deep_rfm_kernel, B=B, D_r=D_r),
        out_shape=jax.ShapeDtypeStruct((n_padded, D), x.dtype),
        grid_spec=grid_spec,
        compiler_params=pltpu.CompilerParams(
            dimension_semantics=("parallel",),
            # Resident footprint at these sizes is ~2 MiB (weights + one row
            # tile + fused xwb buffer), far under every generation's
            # scoped-VMEM default; for very large D/D_r raise
            # vmem_limit_bytes and/or tile over B as well.
        ),
    )(x_bf, w_top_cat, w_bot, b_flat, w_out_t)

    return out[:N] if n_pad else out


def deep_rfm_reference(x, w_in, b_in, w_out):
    """Pure-JAX f32 reference mirroring the PyTorch forward."""
    B = w_in.shape[0]
    D = x.shape[-1]
    y = jnp.concatenate([x, x], axis=-1)
    for i in range(B):
        h = jnp.tanh(y @ w_in[i].T + b_in[i])
        z = h @ w_out[i].T
        y = jnp.concatenate([y[..., :D], z], axis=-1)
    return y[..., D:]


def init_params(key, D, D_r, B):
    """Deterministic init matching PyTorch nn.Linear default:
    U(-1/sqrt(fan_in), 1/sqrt(fan_in))."""
    k1, k2, k3 = jax.random.split(key, 3)
    lim_in = 1.0 / np.sqrt(2 * D)
    lim_out = 1.0 / np.sqrt(D_r)
    w_in = jax.random.uniform(k1, (B, D_r, 2 * D), jnp.float32, -lim_in, lim_in)
    b_in = jax.random.uniform(k2, (B, D_r), jnp.float32, -lim_in, lim_in)
    w_out = jax.random.uniform(k3, (B, D, D_r), jnp.float32, -lim_out, lim_out)
    return w_in, b_in, w_out


if __name__ == "__main__":
    # Small but lane-dense / MXU-friendly demo shapes (feature dims multiples of 128).
    D, D_r, B = 128, 256, 4
    N = 256  # batch of states (leading "..." dims of the PyTorch forward)

    key = jax.random.PRNGKey(0)
    kx, kp = jax.random.split(key)
    x = jax.random.normal(kx, (N, D), jnp.float32)
    w_in, b_in, w_out = init_params(kp, D, D_r, B)

    fwd = jax.jit(deep_rfm_forward)
    out = jax.block_until_ready(fwd(x, w_in, b_in, w_out))

    ref = deep_rfm_reference(x, w_in, b_in, w_out)
    # bf16 matmul operands (f32 accumulation) => relaxed tolerance vs f32 reference.
    np.testing.assert_allclose(np.asarray(out), np.asarray(ref), rtol=5e-2, atol=5e-2)

    print("KERNEL_OK")
</pallas_src>

<mosaic_0001>
module attributes {stable_mosaic.version = 11 : i64} {
  func.func @_deep_rfm_kernel(%arg0: i32, %arg1: memref<128x128xbf16, #tpu.memory_space<vmem>>, %arg2: memref<128x1024xbf16, #tpu.memory_space<vmem>>, %arg3: memref<4x128x256xbf16, #tpu.memory_space<vmem>>, %arg4: memref<1x1024xf32, #tpu.memory_space<vmem>>, %arg5: memref<4x256x128xbf16, #tpu.memory_space<vmem>>, %arg6: memref<128x128xf32, #tpu.memory_space<vmem>>) attributes {dimension_semantics = [#tpu.dimension_semantics<parallel>], iteration_bounds = array<i64: 2>, scalar_prefetch = 0 : i64, scratch_operands = 0 : i64, tpu.core_type = #tpu.core_type<tc>, window_params = [{transform_indices = @transform_0, window_bounds = array<i64: 128, 128>}, {pipeline_mode = #tpu.pipeline_mode<synchronous>, transform_indices = @transform_1, window_bounds = array<i64: 128, 1024>}, {pipeline_mode = #tpu.pipeline_mode<synchronous>, transform_indices = @transform_2, window_bounds = array<i64: 4, 128, 256>}, {pipeline_mode = #tpu.pipeline_mode<synchronous>, transform_indices = @transform_3, window_bounds = array<i64: 1, 1024>}, {pipeline_mode = #tpu.pipeline_mode<synchronous>, transform_indices = @transform_4, window_bounds = array<i64: 4, 256, 128>}, {transform_indices = @transform_5, window_bounds = array<i64: 128, 128>}]} {
    %c0 = arith.constant 0 : index
    %c0_0 = arith.constant 0 : index
    %0 = vector.load %arg1[%c0, %c0_0] : memref<128x128xbf16, #tpu.memory_space<vmem>>, vector<128x128xbf16>
    %c0_1 = arith.constant 0 : index
    %c0_2 = arith.constant 0 : index
    %1 = vector.load %arg2[%c0_1, %c0_2] : memref<128x1024xbf16, #tpu.memory_space<vmem>>, vector<128x1024xbf16>
    %cst = arith.constant dense<0.000000e+00> : vector<128x1024xf32>
    %2 = tpu.matmul %0, %1, %cst {dimension_numbers = #tpu.dot_dimension_numbers<[1], [0], [0], [1], [0, 0, 1, 1], [], []>} : vector<128x128xbf16>, vector<128x1024xbf16>, vector<128x1024xf32> -> vector<128x1024xf32>
    %c0_3 = arith.constant 0 : index
    %c0_4 = arith.constant 0 : index
    %3 = vector.load %arg4[%c0_3, %c0_4] : memref<1x1024xf32, #tpu.memory_space<vmem>>, vector<1x1024xf32>
    %4 = vector.broadcast %3 : vector<1x1024xf32> to vector<128x1024xf32>
    %5 = arith.addf %2, %4 : vector<128x1024xf32>
    %6 = vector.extract_strided_slice %5 {offsets = [0, 0], sizes = [128, 256], strides = [1, 1]} : vector<128x1024xf32> to vector<128x256xf32>
    %c0_5 = arith.constant 0 : index
    %c0_6 = arith.constant 0 : index
    %c0_7 = arith.constant 0 : index
    %7 = vector.load %arg3[%c0_5, %c0_6, %c0_7] : memref<4x128x256xbf16, #tpu.memory_space<vmem>>, vector<1x128x256xbf16>
    %8 = vector.shape_cast %7 : vector<1x128x256xbf16> to vector<128x256xbf16>
    %cst_8 = arith.constant dense<0.000000e+00> : vector<128x256xf32>
    %9 = tpu.matmul %0, %8, %cst_8 {dimension_numbers = #tpu.dot_dimension_numbers<[1], [0], [0], [1], [0, 0, 1, 1], [], []>} : vector<128x128xbf16>, vector<128x256xbf16>, vector<128x256xf32> -> vector<128x256xf32>
    %10 = arith.addf %6, %9 : vector<128x256xf32>
    %11 = math.tanh %10 : vector<128x256xf32>
    %12 = arith.truncf %11 : vector<128x256xf32> to vector<128x256xbf16>
    %c0_9 = arith.constant 0 : index
    %c0_10 = arith.constant 0 : index
    %c0_11 = arith.constant 0 : index
    %13 = vector.load %arg5[%c0_9, %c0_10, %c0_11] : memref<4x256x128xbf16, #tpu.memory_space<vmem>>, vector<1x256x128xbf16>
    %14 = vector.shape_cast %13 : vector<1x256x128xbf16> to vector<256x128xbf16>
    %cst_12 = arith.constant dense<0.000000e+00> : vector<128x128xf32>
    %15 = tpu.matmul %12, %14, %cst_12 {dimension_numbers = #tpu.dot_dimension_numbers<[1], [0], [0], [1], [0, 0, 1, 1], [], []>} : vector<128x256xbf16>, vector<256x128xbf16>, vector<128x128xf32> -> vector<128x128xf32>
    %16 = arith.truncf %15 : vector<128x128xf32> to vector<128x128xbf16>
    %17 = vector.extract_strided_slice %5 {offsets = [0, 256], sizes = [128, 256], strides = [1, 1]} : vector<128x1024xf32> to vector<128x256xf32>
    %c1 = arith.constant 1 : index
    %c0_13 = arith.constant 0 : index
    %c0_14 = arith.constant 0 : index
    %18 = vector.load %arg3[%c1, %c0_13, %c0_14] : memref<4x128x256xbf16, #tpu.memory_space<vmem>>, vector<1x128x256xbf16>
    %19 = vector.shape_cast %18 : vector<1x128x256xbf16> to vector<128x256xbf16>
    %cst_15 = arith.constant dense<0.000000e+00> : vector<128x256xf32>
    %20 = tpu.matmul %16, %19, %cst_15 {dimension_numbers = #tpu.dot_dimension_numbers<[1], [0], [0], [1], [0, 0, 1, 1], [], []>} : vector<128x128xbf16>, vector<128x256xbf16>, vector<128x256xf32> -> vector<128x256xf32>
    %21 = arith.addf %17, %20 : vector<128x256xf32>
    %22 = math.tanh %21 : vector<128x256xf32>
    %23 = arith.truncf %22 : vector<128x256xf32> to vector<128x256xbf16>
    %c1_16 = arith.constant 1 : index
    %c0_17 = arith.constant 0 : index
    %c0_18 = arith.constant 0 : index
    %24 = vector.load %arg5[%c1_16, %c0_17, %c0_18] : memref<4x256x128xbf16, #tpu.memory_space<vmem>>, vector<1x256x128xbf16>
    %25 = vector.shape_cast %24 : vector<1x256x128xbf16> to vector<256x128xbf16>
    %cst_19 = arith.constant dense<0.000000e+00> : vector<128x128xf32>
    %26 = tpu.matmul %23, %25, %cst_19 {dimension_numbers = #tpu.dot_dimension_numbers<[1], [0], [0], [1], [0, 0, 1, 1], [], []>} : vector<128x256xbf16>, vector<256x128xbf16>, vector<128x128xf32> -> vector<128x128xf32>
    %27 = arith.truncf %26 : vector<128x128xf32> to vector<128x128xbf16>
    %28 = vector.extract_strided_slice %5 {offsets = [0, 512], sizes = [128, 256], strides = [1, 1]} : vector<128x1024xf32> to vector<128x256xf32>
    %c2 = arith.constant 2 : index
    %c0_20 = arith.constant 0 : index
    %c0_21 = arith.constant 0 : index
    %29 = vector.load %arg3[%c2, %c0_20, %c0_21] : memref<4x128x256xbf16, #tpu.memory_space<vmem>>, vector<1x128x256xbf16>
    %30 = vector.shape_cast %29 : vector<1x128x256xbf16> to vector<128x256xbf16>
    %cst_22 = arith.constant dense<0.000000e+00> : vector<128x256xf32>
    %31 = tpu.matmul %27, %30, %cst_22 {dimension_numbers = #tpu.dot_dimension_numbers<[1], [0], [0], [1], [0, 0, 1, 1], [], []>} : vector<128x128xbf16>, vector<128x256xbf16>, vector<128x256xf32> -> vector<128x256xf32>
    %32 = arith.addf %28, %31 : vector<128x256xf32>
    %33 = math.tanh %32 : vector<128x256xf32>
    %34 = arith.truncf %33 : vector<128x256xf32> to vector<128x256xbf16>
    %c2_23 = arith.constant 2 : index
    %c0_24 = arith.constant 0 : index
    %c0_25 = arith.constant 0 : index
    %35 = vector.load %arg5[%c2_23, %c0_24, %c0_25] : memref<4x256x128xbf16, #tpu.memory_space<vmem>>, vector<1x256x128xbf16>
    %36 = vector.shape_cast %35 : vector<1x256x128xbf16> to vector<256x128xbf16>
    %cst_26 = arith.constant dense<0.000000e+00> : vector<128x128xf32>
    %37 = tpu.matmul %34, %36, %cst_26 {dimension_numbers = #tpu.dot_dimension_numbers<[1], [0], [0], [1], [0, 0, 1, 1], [], []>} : vector<128x256xbf16>, vector<256x128xbf16>, vector<128x128xf32> -> vector<128x128xf32>
    %38 = arith.truncf %37 : vector<128x128xf32> to vector<128x128xbf16>
    %39 = vector.extract_strided_slice %5 {offsets = [0, 768], sizes = [128, 256], strides = [1, 1]} : vector<128x1024xf32> to vector<128x256xf32>
    %c3 = arith.constant 3 : index
    %c0_27 = arith.constant 0 : index
    %c0_28 = arith.constant 0 : index
    %40 = vector.load %arg3[%c3, %c0_27, %c0_28] : memref<4x128x256xbf16, #tpu.memory_space<vmem>>, vector<1x128x256xbf16>
    %41 = vector.shape_cast %40 : vector<1x128x256xbf16> to vector<128x256xbf16>
    %cst_29 = arith.constant dense<0.000000e+00> : vector<128x256xf32>
    %42 = tpu.matmul %38, %41, %cst_29 {dimension_numbers = #tpu.dot_dimension_numbers<[1], [0], [0], [1], [0, 0, 1, 1], [], []>} : vector<128x128xbf16>, vector<128x256xbf16>, vector<128x256xf32> -> vector<128x256xf32>
    %43 = arith.addf %39, %42 : vector<128x256xf32>
    %44 = math.tanh %43 : vector<128x256xf32>
    %45 = arith.truncf %44 : vector<128x256xf32> to vector<128x256xbf16>
    %c3_30 = arith.constant 3 : index
    %c0_31 = arith.constant 0 : index
    %c0_32 = arith.constant 0 : index
    %46 = vector.load %arg5[%c3_30, %c0_31, %c0_32] : memref<4x256x128xbf16, #tpu.memory_space<vmem>>, vector<1x256x128xbf16>
    %47 = vector.shape_cast %46 : vector<1x256x128xbf16> to vector<256x128xbf16>
    %cst_33 = arith.constant dense<0.000000e+00> : vector<128x128xf32>
    %48 = tpu.matmul %45, %47, %cst_33 {dimension_numbers = #tpu.dot_dimension_numbers<[1], [0], [0], [1], [0, 0, 1, 1], [], []>} : vector<128x256xbf16>, vector<256x128xbf16>, vector<128x128xf32> -> vector<128x128xf32>
    %c0_34 = arith.constant 0 : index
    %c0_35 = arith.constant 0 : index
    %49 = vector.load %arg6[%c0_34, %c0_35] : memref<128x128xf32, #tpu.memory_space<vmem>>, vector<128x128xf32>
    tpu.vector_store %arg6[%c0_34, %c0_35], %48 {strides = array<i32>} : memref<128x128xf32, #tpu.memory_space<vmem>>, vector<128x128xf32>,
    return
  }
  func.func @transform_0(%arg0: i32) -> (i32, i32) {
    %c0_i32 = arith.constant 0 : i32
    %c0_i32_0 = arith.constant 0 : i32
    return %arg0, %c0_i32 : i32, i32
  }
  func.func @transform_1(%arg0: i32) -> (i32, i32) {
    %c0_i32 = arith.constant 0 : i32
    %c0_i32_0 = arith.constant 0 : i32
    %c0_i32_1 = arith.constant 0 : i32
    return %c0_i32, %c0_i32_0 : i32, i32
  }
  func.func @transform_2(%arg0: i32) -> (i32, i32, i32) {
    %c0_i32 = arith.constant 0 : i32
    %c0_i32_0 = arith.constant 0 : i32
    %c0_i32_1 = arith.constant 0 : i32
    %c0_i32_2 = arith.constant 0 : i32
    return %c0_i32, %c0_i32_0, %c0_i32_1 : i32, i32, i32
  }
  func.func @transform_3(%arg0: i32) -> (i32, i32) {
    %c0_i32 = arith.constant 0 : i32
    %c0_i32_0 = arith.constant 0 : i32
    %c0_i32_1 = arith.constant 0 : i32
    return %c0_i32, %c0_i32_0 : i32, i32
  }
  func.func @transform_4(%arg0: i32) -> (i32, i32, i32) {
    %c0_i32 = arith.constant 0 : i32
    %c0_i32_0 = arith.constant 0 : i32
    %c0_i32_1 = arith.constant 0 : i32
    %c0_i32_2 = arith.constant 0 : i32
    return %c0_i32, %c0_i32_0, %c0_i32_1 : i32, i32, i32
  }
  func.func @transform_5(%arg0: i32) -> (i32, i32) {
    %c0_i32 = arith.constant 0 : i32
    %c0_i32_0 = arith.constant 0 : i32
    return %arg0, %c0_i32 : i32, i32
  }
}

</mosaic_0001>

<bundles_post_ra>
// kernel: deep_rfm_forward.1
= control target key start
LH: loop header
LB: loop body
LE: loop exit
PB: predicated region body
PF: predicated region fallthrough
CT: control target
= control target key end

     0   :  { %10 = vsyncpa [#allocation3], 0  ;;  %s5784_s0 = inlined_call_operand.vmem [shape: bf16[256,128], index: 0, kind: input, shape index: {}]   ;;  %s5785_s1 = inlined_call_operand.vmem [shape: bf16[128,1024], index: 1, kind: input, shape index: {}]   ;;  %s5786_s2 = inlined_call_operand.vmem [shape: bf16[4,128,256], index: 2, kind: input, shape index: {}]   ;;  %s5787_s3 = inlined_call_operand.vmem [shape: f32[1,1024], index: 3, kind: input, shape index: {}]   ;;  %s5788_s4 = inlined_call_operand.vmem [shape: bf16[4,256,128], index: 4, kind: input, shape index: {}]   ;;  %s5789_s5 = inlined_call_operand.hbm [shape: f32[256,128], index: 5, kind: output, shape index: {}]  }
   0x1   :  { %12 = vsyncpa [#allocation3 + $0x1], 0  ;;  %s4781_s18 = smov 0   ;;  %s4783_s19 = smov 0  }
   0x2   :  { %s4785_s20 = smov 0   ;;  %s4787_s21 = smov 0  }
   0x3 LB: > { %s4802_s22 = sadd.s32 4294967295, %s4745_s21   ;;  %s3347_s23 = sadd.s32 4294967294, %s4745_s21   ;;  %s4745_s21 = sphi %s4787_s21, %s5795_s21   ;;  %s4741_s20 = sphi %s4785_s20, %s5794_s20   ;;  %s4737_s19 = sphi %s4783_s19, %s5793_s19   ;;  %s4733_s18 = sphi %s4781_s18, %s5792_s18  }
   0x4   : > { %s4806_s24 = sadd.s32 1, %s4745_s21   ;;  %s135_s25 = sadd.s32 1, %s4741_s20 }
   0x5   : > { %s132_s26 = ssub.s32 %s4745_s21, %s4806_s24  ;;  %p145_p0 = scmp.ne.s32.totalorder %s4741_s20, %s4737_s19 }
   0x6   : > { %p133_p1 = scmp.eq.s32.totalorder %s132_s26, 0  ;;  %p146_p2 = scmp.eq.s32.totalorder %s4802_s22, 1 }
   0x7   : > { %p151_p3 = scmp.ne.s32.totalorder %s4737_s19, %s4733_s18  ;;  %p152_p4 = scmp.eq.s32.totalorder %s3347_s23, 1 }
   0x8   : > { %s4817_s27 = scalar_select %p133_p1, %s4741_s20, %s135_s25  }
   0x9   : > { %p4819_p5 = por %p146_p2, %p145_p0  ;;  %p4823_p6 = por %p152_p4, %p151_p3 }
   0xa   : > { %p3350_p7 = scmp.ge.s32.totalorder %s4745_s21, 1  ;;  %p191_p8 = scmp.lt.s32.totalorder %s4745_s21, 3 }
   0xc   : > { %p192_p9 = pnand %p3350_p7, %p191_p8 }
   0xd   : > { %v243_v0 = vld [vmem:[%s5785_s1] sm:$0xff] (!%p192_p9)  ;;  %s3352_s11 = sshll.u32 (!%p192_p9), %s4802_s22, 4  ;;  %v4747_v6 = vmov (!%p192_p9), 0   ;;  %v245_v32 = vld [vmem:[%s5785_s1 + $0x10] sm:$0xff] (!%p192_p9)  ;;  %s216_s17 = sand.u32 (!%p192_p9), 1, %s4737_s19  }
   0xe   : > { %195 = sbr.rel (%p192_p9) target bundleno = 2046 (0x7fe), region = 40  ;;  %v247_v1 = vld [vmem:[%s5785_s1 + $0x20] sm:$0xff] (!%p192_p9)  ;;  %749 = vmatprep.mubr.bf16.mxu0 (!%p192_p9), %v4747_v6  ;;  %p220_p10 = scmp.lt.s32.totalorder (!%p192_p9), %s3352_s11, 31  ;;  %862 = vmatprep.mubr.bf16.mxu1 (!%p192_p9), %v4747_v6  ;;  %v249_v33 = vld [vmem:[%s5785_s1 + $0x30] sm:$0xff] (!%p192_p9) }
   0xf   : > { %v251_v2 = vld [vmem:[%s5785_s1 + $0x40] sm:$0xff] (!%p192_p9)  ;;  %v3363_v3 = vcombine.high (!%p192_p9), %v243_v0, %v247_v1  ;;  %v3362_v4 = vcombine.low (!%p192_p9), %v243_v0, %v247_v1  ;;  %v253_v35 = vld [vmem:[%s5785_s1 + $0x50] sm:$0xff] (!%p192_p9)  ;;  %v3367_v38 = vcombine.high (!%p192_p9), %v245_v32, %v249_v33  ;;  %v3366_v39 = vcombine.low (!%p192_p9), %v245_v32, %v249_v33  ;;  %s3703_s26 = sshll.u32 (!%p192_p9), %s4802_s22, 11  ;;  %s5743_s22 = scalar_lea.sflag (!%p192_p9), [#allocation3], %s216_s17 }
  0x10   : > { %v255_v5 = vld [vmem:[%s5785_s1 + $0x60] sm:$0xff] (!%p192_p9)  ;;  %v257_v36 = vld [vmem:[%s5785_s1 + $0x70] sm:$0xff] (!%p192_p9)  ;;  %s5735_s7 = scalar_lea.hbm (!%p192_p9), %s5789_s5, %s3703_s26  ;;  %s4748_s10 = smov (!%p192_p9), [#allocation2]  }
  0x11   : > { %v3371_v7 = vcombine.high (!%p192_p9), %v251_v2, %v255_v5  ;;  %v259_v8 = vld [vmem:[%s5785_s1 + $0x80] sm:$0xff] (!%p192_p9)  ;;  %717 = vmatprep.subr.bf16.mxu0 (!%p192_p9), %v3363_v3  ;;  %v3370_v10 = vcombine.low (!%p192_p9), %v251_v2, %v255_v5  ;;  %v261_v40 = vld [vmem:[%s5785_s1 + $0x90] sm:$0xff] (!%p192_p9)  ;;  %v3375_v42 = vcombine.high (!%p192_p9), %v253_v35, %v257_v36  ;;  %v3374_v43 = vcombine.low (!%p192_p9), %v253_v35, %v257_v36  ;;  %v284_v36 = vld [vmem:[%s5785_s1 + $0x148] sm:$0xff] (!%p192_p9)  ;;  %s4687_s12 = sshll.u32 (!%p192_p9), %s4748_s10, 4  ;;  %s4688_s12 = int_to_ptr.vmem [resolvable:$false] %s4687_s12 }
  0x12   : > { %v263_v9 = vld [vmem:[%s5785_s1 + $0xa0] sm:$0xff] (!%p192_p9)  ;;  %718 = vmatpush1.bf16.msra.mxu0 (!%p192_p9), %v3362_v4  ;;  %v265_v41 = vld [vmem:[%s5785_s1 + $0xb0] sm:$0xff] (!%p192_p9) }
  0x13   : > { %719 = vmatprep.subr.bf16.mxu0 (!%p192_p9), %v3371_v7  ;;  %v3379_v11 = vcombine.high (!%p192_p9), %v259_v8, %v263_v9  ;;  %v267_v12 = vld [vmem:[%s5785_s1 + $0xc0] sm:$0xff] (!%p192_p9)  ;;  %v3378_v14 = vcombine.low (!%p192_p9), %v259_v8, %v263_v9  ;;  %v269_v44 = vld [vmem:[%s5785_s1 + $0xd0] sm:$0xff] (!%p192_p9)  ;;  %v3383_v47 = vcombine.high (!%p192_p9), %v261_v40, %v265_v41  ;;  %v3382_v48 = vcombine.low (!%p192_p9), %v261_v40, %v265_v41 }
  0x14   : > { %v271_v13 = vld [vmem:[%s5785_s1 + $0xe0] sm:$0xff] (!%p192_p9)  ;;  %v273_v45 = vld [vmem:[%s5785_s1 + $0xf0] sm:$0xff] (!%p192_p9) }
  0x15   : > { %s5797_s11 = smov (!%p220_p10, %s3352_s11), 31  ;;  %v3387_v15 = vcombine.high %v267_v12, %v271_v13  ;;  %v275_v16 = vld [vmem:[%s5785_s1 + $0x100] sm:$0xff]  ;;  %v3386_v18 = vcombine.low %v267_v12, %v271_v13  ;;  %v277_v49 = vld [vmem:[%s5785_s1 + $0x110] sm:$0xff]  ;;  %v3391_v51 = vcombine.high %v269_v44, %v273_v45  ;;  %v3390_v52 = vcombine.low %v269_v44, %v273_v45  ;;  %v248_v12 = vld [vmem:[%s5785_s1 + $0x28] sm:$0xff] }
  0x16   : > { %s3353_s23 = sshll.u32 %s5797_s11, 2  ;;  %720 = vmatpush1.bf16.msra.mxu0 %v3370_v10  ;;  %v279_v17 = vld [vmem:[%s5785_s1 + $0x120] sm:$0xff]  ;;  %v281_v50 = vld [vmem:[%s5785_s1 + $0x130] sm:$0xff]  ;;  %v252_v13 = vld [vmem:[%s5785_s1 + $0x48] sm:$0xff]  ;;  %s4689_s11 = scalar_lea.vmem %s4688_s12, 4096 }
  0x17   : > { %s4859_s9 = scalar_lea.vmem %s5784_s0, %s3353_s23  ;;  %721 = vmatprep.subr.bf16.mxu0 %v3379_v11  ;;  %v3395_v19 = vcombine.high %v275_v16, %v279_v17  ;;  %v283_v20 = vld [vmem:[%s5785_s1 + $0x140] sm:$0xff]  ;;  %v3394_v22 = vcombine.low %v275_v16, %v279_v17  ;;  %v285_v53 = vld [vmem:[%s5785_s1 + $0x150] sm:$0xff]  ;;  %v3399_v56 = vcombine.high %v277_v49, %v281_v50  ;;  %v3398_v57 = vcombine.low %v277_v49, %v281_v50  ;;  %v244_v11 = vld [vmem:[%s5785_s1 + $0x8] sm:$0xff]  ;;  %s3351_s23 = sshll.u32 %s216_s17, 7 }
  0x18   : > { %v287_v21 = vld [vmem:[%s5785_s1 + $0x160] sm:$0xff]  ;;  %v4915_v46 = vld [vmem:[%s4859_s9 + $0x8] sm:$0xff]   ;;  %v289_v54 = vld [vmem:[%s5785_s1 + $0x170] sm:$0xff]  ;;  %s5714_s25 = scalar_lea.vmem [#allocation2], %s3351_s23 }
  0x19   : > { %v3403_v23 = vcombine.high %v283_v20, %v287_v21  ;;  %v291_v24 = vld [vmem:[%s5785_s1 + $0x180] sm:$0xff]  ;;  %v3402_v26 = vcombine.low %v283_v20, %v287_v21  ;;  %v4932_v55 = vld [vmem:[%s4859_s9 + $0x10] sm:$0xff]   ;;  %v3407_v60 = vcombine.high %v285_v53, %v289_v54  ;;  %v3406_v61 = vcombine.low %v285_v53, %v289_v54  ;;  %v4949_v0 = vld [vmem:[%s4859_s9 + $0x18] sm:$0xff]  }
  0x1a   : > { %722 = vmatpush1.bf16.msra.mxu0 %v3378_v14  ;;  %v295_v25 = vld [vmem:[%s5785_s1 + $0x1a0] sm:$0xff]  ;;  %v293_v58 = vld [vmem:[%s5785_s1 + $0x190] sm:$0xff]  ;;  %v4962_v8 = vld [vmem:[%s4859_s9 + $0x28] sm:$0xff]   ;;  %v3365_v14 = vcombine.high %v244_v11, %v248_v12 }
  0x1b   : > { %723 = vmatprep.subr.bf16.mxu0 %v3387_v15  ;;  %v3411_v27 = vcombine.high %v291_v24, %v295_v25  ;;  %v299_v28 = vld [vmem:[%s5785_s1 + $0x1c0] sm:$0xff]  ;;  %v3410_v30 = vcombine.low %v291_v24, %v295_v25  ;;  %v297_v59 = vld [vmem:[%s5785_s1 + $0x1b0] sm:$0xff]  ;;  %v4972_v10 = vld [vmem:[%s4859_s9 + $0x38] sm:$0xff]   ;;  %v3364_v15 = vcombine.low %v244_v11, %v248_v12 }
  0x1c   : > { %v303_v29 = vld [vmem:[%s5785_s1 + $0x1e0] sm:$0xff]  ;;  %v301_v62 = vld [vmem:[%s5785_s1 + $0x1d0] sm:$0xff]  ;;  %v3415_v1 = vcombine.high %v293_v58, %v297_v59  ;;  %v3414_v2 = vcombine.low %v293_v58, %v297_v59  ;;  %v256_v16 = vld [vmem:[%s5785_s1 + $0x68] sm:$0xff]  ;;  %830 = vmatprep.subr.bf16.mxu1 %v3365_v14 }
  0x1d   : > { %v3419_v31 = vcombine.high %v299_v28, %v303_v29  ;;  %v3418_v34 = vcombine.low %v299_v28, %v303_v29  ;;  %v4898_v37 = vld [vmem:[%s4859_s9] sm:$0xff]   ;;  %v305_v63 = vld [vmem:[%s5785_s1 + $0x1f0] sm:$0xff]  ;;  %v3373_v17 = vcombine.high %v252_v13, %v256_v16  ;;  %831 = vmatpush1.bf16.msra.mxu1 %v3364_v15  ;;  %v3372_v20 = vcombine.low %v252_v13, %v256_v16  ;;  %v268_v24 = vld [vmem:[%s5785_s1 + $0xc8] sm:$0xff] }
  0x1e   : > { %724 = vmatpush1.bf16.msra.mxu0 %v3386_v18  ;;  %v3423_v3 = vcombine.high %v301_v62, %v305_v63  ;;  %v4268_v4 = vld [vmem:[%s5786_s2 + $0x4] ss:$8 sps:$4 sm:$0xff]   ;;  %v3422_v5 = vcombine.low %v301_v62, %v305_v63  ;;  %v4967_v9 = vld [vmem:[%s4859_s9 + $0x30] sm:$0xff]   ;;  %v4266_v21 = vld [vmem:[%s5786_s2] ss:$8 sps:$4 sm:$0xff]  }
  0x1f   : > { %725 = vmatprep.subr.bf16.mxu0 %v3395_v19  ;;  %v4957_v7 = vld [vmem:[%s4859_s9 + $0x20] sm:$0xff]   ;;  %v260_v18 = vld [vmem:[%s5785_s1 + $0x88] sm:$0xff]  ;;  %832 = vmatprep.subr.bf16.mxu1 %v3373_v17  ;;  %v4275_v40 = vld [vmem:[%s5786_s2 + $0x30] ss:$8 sps:$4 sm:$0xff]   ;;  %s3285_s9 = sshll.u32 %s5714_s25, 4  ;;  %s5737_s9 = int_to_ptr.vmem [resolvable:$true] %s3285_s9 }
  0x20   : > { %v264_v19 = vld [vmem:[%s5785_s1 + $0xa8] sm:$0xff]  ;;  %v4281_v53 = vld [vmem:[%s5786_s2 + $0x50] ss:$8 sps:$4 sm:$0xff]   ;;  %s4683_s8 = scalar_lea.vmem %s5737_s9, 2048  ;;  %p4690_p0 = scmp.lt.s32.totalorder %s5737_s9, %s4688_s12 }
  0x21   : > { %v272_v25 = vld [vmem:[%s5785_s1 + $0xe8] sm:$0xff]  ;;  %833 = vmatpush1.bf16.msra.mxu1 %v3372_v20  ;;  %v250_v58 = vld [vmem:[%s5785_s1 + $0x38] sm:$0xff]  ;;  %p4684_p11 = scmp.ne.s32.totalorder %s5737_s9, %s4683_s8  ;;  %p4691_p1 = scmp.lt.s32.totalorder %s4689_s11, %s4683_s8 }
  0x22   : > { %726 = vmatpush1.bf16.msra.mxu0 %v3394_v22  ;;  %v4271_v22 = vld [vmem:[%s5786_s2 + $0x14] ss:$8 sps:$4 sm:$0xff]   ;;  %v3389_v28 = vcombine.high %v268_v24, %v272_v25  ;;  %v4274_v29 = vld [vmem:[%s5786_s2 + $0x24] ss:$8 sps:$4 sm:$0xff]   ;;  %v3388_v32 = vcombine.low %v268_v24, %v272_v25  ;;  %v4272_v33 = vld [vmem:[%s5786_s2 + $0x20] ss:$8 sps:$4 sm:$0xff]  }
  0x23   : > { %727 = vmatprep.subr.bf16.mxu0 %v3403_v23  ;;  %v3381_v23 = vcombine.high %v260_v18, %v264_v19  ;;  %v296_v44 = vld [vmem:[%s5785_s1 + $0x1a8] sm:$0xff]  ;;  %v254_v63 = vld [vmem:[%s5785_s1 + $0x58] sm:$0xff]  ;;  %p4685_p12 = pnand %p4684_p11, %p4819_p5  ;;  %p4692_p2 = por %p4691_p1, %p4690_p0 }
  0x24   : > { %v300_v50 = vld [vmem:[%s5785_s1 + $0x1c8] sm:$0xff]  ;;  %v266_v11 = vld [vmem:[%s5785_s1 + $0xb8] sm:$0xff] }
  0x25   : > { %834 = vmatprep.subr.bf16.mxu1 %v3381_v23  ;;  %v270_v14 = vld [vmem:[%s5785_s1 + $0xd8] sm:$0xff]  ;;  %p4686_p13 = pneg %p4685_p12 }
  0x26   : > { %728 = vmatpush1.bf16.msra.mxu0 %v3402_v26  ;;  %v3380_v26 = vcombine.low %v260_v18, %v264_v19  ;;  %v274_v15 = vld [vmem:[%s5785_s1 + $0xf8] sm:$0xff] }
  0x27   : > { %729 = vmatprep.subr.bf16.mxu0 %v3411_v27  ;;  %v4269_v27 = vld [vmem:[%s5786_s2 + $0x10] ss:$8 sps:$4 sm:$0xff]   ;;  %v3393_v17 = vcombine.high %v270_v14, %v274_v15  ;;  %v3392_v20 = vcombine.low %v270_v14, %v274_v15  ;;  %p4693_p3 = pnand %p4692_p2, %p4686_p13 }
  0x28   : > { %835 = vmatpush1.bf16.msra.mxu1 %v3380_v26  ;;  %v278_v18 = vld [vmem:[%s5785_s1 + $0x118] sm:$0xff] }
  0x29   : > { %836 = vmatprep.subr.bf16.mxu1 %v3389_v28  ;;  %v282_v19 = vld [vmem:[%s5785_s1 + $0x138] sm:$0xff] }
  0x2a   : > { %730 = vmatpush1.bf16.msra.mxu0 %v3410_v30  ;;  %v276_v30 = vld [vmem:[%s5785_s1 + $0x108] sm:$0xff]  ;;  %v290_v23 = vld [vmem:[%s5785_s1 + $0x178] sm:$0xff]  ;;  %v3400_v24 = vcombine.low %v278_v18, %v282_v19 }
  0x2b   : > { %731 = vmatprep.subr.bf16.mxu0 %v3419_v31  ;;  %v280_v31 = vld [vmem:[%s5785_s1 + $0x128] sm:$0xff]  ;;  %v294_v26 = vld [vmem:[%s5785_s1 + $0x198] sm:$0xff] }
  0x2c   : > { %v3397_v35 = vcombine.high %v276_v30, %v280_v31  ;;  %837 = vmatpush1.bf16.msra.mxu1 %v3388_v32 }
  0x2e   : > { %732 = vmatpush1.bf16.msra.mxu0 %v3418_v34  ;;  %v4277_v34 = vld [vmem:[%s5786_s2 + $0x34] ss:$8 sps:$4 sm:$0xff]   ;;  %838 = vmatprep.subr.bf16.mxu1 %v3397_v35  ;;  %v4290_v35 = vld [vmem:[%s5788_s4 + $0x40] sm:$0xff]  }
  0x2f   : > { %943 = vmatprep.subr.bf16.mxu0 %v3367_v38  ;;  %v288_v38 = vld [vmem:[%s5785_s1 + $0x168] sm:$0xff] }
  0x30   : > { %v3405_v41 = vcombine.high %v284_v36, %v288_v38  ;;  %v3404_v45 = vcombine.low %v284_v36, %v288_v38  ;;  %v4291_v36 = vld [vmem:[%s5788_s4] sm:$0xff]   ;;  %v4292_v38 = vld [vmem:[%s5788_s4 + $0x48] sm:$0xff]  }
  0x31   : > { %750 = vmatmul.mubr.bf16.vlgmr.msra.gmra.mrb[0].mxu0 %v4898_v37 }
  0x32   : > { %944 = vmatpush1.bf16.msra.mxu0 %v3366_v39  ;;  %759 = vmatprep.mubr.bf16.mxu0 %v4747_v6  ;;  %v3396_v39 = vcombine.low %v276_v30, %v280_v31  ;;  %v302_v30 = vld [vmem:[%s5785_s1 + $0x1d8] sm:$0xff] }
  0x33   : > { %945 = vmatprep.subr.bf16.mxu0 %v3375_v42  ;;  %v4280_v42 = vld [vmem:[%s5786_s2 + $0x44] ss:$8 sps:$4 sm:$0xff]   ;;  %v306_v31 = vld [vmem:[%s5785_s1 + $0x1f8] sm:$0xff] }
  0x34   : > { %839 = vmatpush1.bf16.msra.mxu1 %v3396_v39  ;;  %v4293_v39 = vld [vmem:[%s5788_s4 + $0x8] sm:$0xff]  }
  0x35   : > { %840 = vmatprep.subr.bf16.mxu1 %v3405_v41  ;;  %v4295_v41 = vld [vmem:[%s5788_s4 + $0x10] sm:$0xff]  }
  0x36   : > { %946 = vmatpush1.bf16.msra.mxu0 %v3374_v43  ;;  %v292_v43 = vld [vmem:[%s5785_s1 + $0x188] sm:$0xff] }
  0x37   : > { %947 = vmatprep.subr.bf16.mxu0 %v3383_v47  ;;  %v4278_v47 = vld [vmem:[%s5786_s2 + $0x40] ss:$8 sps:$4 sm:$0xff]   ;;  %v3413_v49 = vcombine.high %v292_v43, %v296_v44 }
  0x38   : > { %841 = vmatpush1.bf16.msra.mxu1 %v3404_v45  ;;  %v4301_v45 = vld [vmem:[%s5788_s4 + $0x28] sm:$0xff]  }
  0x39   : > { %760 = vmatmul.mubr.bf16.gmra.mrb[4].mxu0 %v4915_v46  ;;  %842 = vmatprep.subr.bf16.mxu1 %v3413_v49  ;;  %v5236_v49 = vld [vmem:[%s5787_s3] sm:$0xff] }
  0x3a   : > { %769 = vmatprep.mubr.bf16.mxu0 %v4747_v6  ;;  %948 = vmatpush1.bf16.msra.mxu0 %v3382_v48  ;;  %v4283_v48 = vld [vmem:[%s5786_s2 + $0x54] ss:$8 sps:$4 sm:$0xff]  }
  0x3b   : > { %949 = vmatprep.subr.bf16.mxu0 %v3391_v51  ;;  %v304_v51 = vld [vmem:[%s5785_s1 + $0x1e8] sm:$0xff] }
  0x3c   : > { %v3421_v54 = vcombine.high %v300_v50, %v304_v51  ;;  %v3420_v59 = vcombine.low %v300_v50, %v304_v51 }
  0x3e   : > { %950 = vmatpush1.bf16.msra.mxu0 %v3390_v52  ;;  %v3412_v52 = vcombine.low %v292_v43, %v296_v44  ;;  %v4298_v43 = vld [vmem:[%s5788_s4 + $0x60] sm:$0xff]  }
  0x3f   : > { %951 = vmatprep.subr.bf16.mxu0 %v3399_v56  ;;  %v4286_v56 = vld [vmem:[%s5786_s2 + $0x64] ss:$8 sps:$4 sm:$0xff]  }
  0x40   : > { %843 = vmatpush1.bf16.msra.mxu1 %v3412_v52  ;;  %v4299_v44 = vld [vmem:[%s5788_s4 + $0x20] sm:$0xff]  }
  0x41   : > { %770 = vmatmul.mubr.bf16.gmra.mrb[8].mxu0 %v4932_v55  ;;  %844 = vmatprep.subr.bf16.mxu1 %v3421_v54 }
  0x42   : > { %779 = vmatprep.mubr.bf16.mxu0 %v4747_v6  ;;  %952 = vmatpush1.bf16.msra.mxu0 %v3398_v57  ;;  %v246_v57 = vld [vmem:[%s5785_s1 + $0x18] sm:$0xff] }
  0x43   : > { %953 = vmatprep.subr.bf16.mxu0 %v3407_v60  ;;  %v4284_v60 = vld [vmem:[%s5786_s2 + $0x60] ss:$8 sps:$4 sm:$0xff]   ;;  %v3369_v62 = vcombine.high %v246_v57, %v250_v58 }
  0x44   : > { %845 = vmatpush1.bf16.msra.mxu1 %v3420_v59 }
  0x45   : > { %1056 = vmatprep.subr.bf16.mxu1 %v3369_v62 }
  0x46   : > { %954 = vmatpush1.bf16.msra.mxu0 %v3406_v61  ;;  %v4289_v61 = vld [vmem:[%s5786_s2 + $0x74] ss:$8 sps:$4 sm:$0xff]  }
  0x47   : > { %955 = vmatprep.subr.bf16.mxu0 %v3415_v1  ;;  %v258_v1 = vld [vmem:[%s5785_s1 + $0x78] sm:$0xff]  ;;  %863 = vmatmul.mubr.bf16.vlgmr.msra.gmra.mrb[0].mxu1 %v4898_v37 }
  0x48   : > { %872 = vmatprep.mubr.bf16.mxu1 %v4747_v6  ;;  %v3376_v12 = vcombine.low %v254_v63, %v258_v1 }
  0x49   : > { %780 = vmatmul.mubr.bf16.gmra.mrb[12].mxu0 %v4949_v0 }
  0x4a   : > { %789 = vmatprep.mubr.bf16.mxu0 %v4747_v6  ;;  %956 = vmatpush1.bf16.msra.mxu0 %v3414_v2  ;;  %v3368_v2 = vcombine.low %v246_v57, %v250_v58 }
  0x4b   : > { %957 = vmatprep.subr.bf16.mxu0 %v3423_v3  ;;  %v4287_v3 = vld [vmem:[%s5786_s2 + $0x70] ss:$8 sps:$4 sm:$0xff]  }
  0x4c   : > { %1057 = vmatpush1.bf16.msra.mxu1 %v3368_v2 }
  0x4e   : > { %958 = vmatpush1.bf16.msra.mxu0 %v3422_v5  ;;  %v262_v5 = vld [vmem:[%s5785_s1 + $0x98] sm:$0xff] }
  0x4f   : > { %1265 = vmatprep.subr.bf16.mxu0 %v4268_v4  ;;  %v3377_v4 = vcombine.high %v254_v63, %v258_v1  ;;  %v3385_v13 = vcombine.high %v262_v5, %v266_v11  ;;  %v3384_v16 = vcombine.low %v262_v5, %v266_v11  ;;  %873 = vmatmul.mubr.bf16.gmra.mrb[4].mxu1 %v4915_v46 }
  0x50   : > { %882 = vmatprep.mubr.bf16.mxu1 %v4747_v6 }
  0x51   : > { %790 = vmatmul.mubr.bf16.gmra.mrb[16].mxu0 %v4957_v7  ;;  %1058 = vmatprep.subr.bf16.mxu1 %v3377_v4 }
  0x52   : > { %799 = vmatprep.mubr.bf16.mxu0 %v4747_v6  ;;  %1059 = vmatpush1.bf16.msra.mxu1 %v3376_v12 }
  0x53   : > { %1060 = vmatprep.subr.bf16.mxu1 %v3385_v13 }
  0x56   : > { %1061 = vmatpush1.bf16.msra.mxu1 %v3384_v16 }
  0x57   : > { %1062 = vmatprep.subr.bf16.mxu1 %v3393_v17  ;;  %883 = vmatmul.mubr.bf16.gmra.mrb[8].mxu1 %v4932_v55 }
  0x58   : > { %892 = vmatprep.mubr.bf16.mxu1 %v4747_v6 }
  0x59   : > { %800 = vmatmul.mubr.bf16.gmra.mrb[20].mxu0 %v4962_v8 }
  0x5a   : > { %809 = vmatprep.mubr.bf16.mxu0 %v4747_v6  ;;  %1063 = vmatpush1.bf16.msra.mxu1 %v3392_v20 }
  0x5f   : > { %893 = vmatmul.mubr.bf16.gmra.mrb[12].mxu1 %v4949_v0 }
  0x60   : > { %902 = vmatprep.mubr.bf16.mxu1 %v4747_v6 }
  0x61   : > { %810 = vmatmul.mubr.bf16.gmra.mrb[24].mxu0 %v4967_v9 }
  0x62   : > { %819 = vmatprep.mubr.bf16.mxu0 %v4747_v6 }
  0x67   : > { %903 = vmatmul.mubr.bf16.gmra.mrb[16].mxu1 %v4957_v7 }
  0x68   : > { %912 = vmatprep.mubr.bf16.mxu1 %v4747_v6 }
  0x69   : > { %820 = vmatmul.mubr.bf16.gmra.mrb[28].mxu0 %v4972_v10 }
  0x6a   : > { %975 = vmatprep.mubr.bf16.mxu0 %v4747_v6 }
  0x6f   : > { %913 = vmatmul.mubr.bf16.gmra.mrb[20].mxu1 %v4962_v8 }
  0x70   : > { %922 = vmatprep.mubr.bf16.mxu1 %v4747_v6 }
  0x71   : > { %976 = vmatmul.mubr.bf16.vlgmr.msra.gmra.mrb[32].mxu0 %v4898_v37 }
  0x72   : > { %1266 = vmatpush1.bf16.msra.mxu0 %v4266_v21  ;;  %985 = vmatprep.mubr.bf16.mxu0 %v4747_v6  ;;  %v3401_v21 = vcombine.high %v278_v18, %v282_v19 }
  0x73   : > { %1267 = vmatprep.subr.bf16.mxu0 %v4271_v22  ;;  %v286_v22 = vld [vmem:[%s5785_s1 + $0x158] sm:$0xff] }
  0x74   : > { %1064 = vmatprep.subr.bf16.mxu1 %v3401_v21  ;;  %v3409_v25 = vcombine.high %v286_v22, %v290_v23  ;;  %v3408_v28 = vcombine.low %v286_v22, %v290_v23  ;;  %v4306_v21 = vld [vmem:[%s5786_s2 + $0x80] ss:$8 sps:$4 sm:$0xff]  }
  0x75   : > { %1065 = vmatpush1.bf16.msra.mxu1 %v3400_v24  ;;  %v4311_v24 = vld [vmem:[%s5786_s2 + $0x94] ss:$8 sps:$4 sm:$0xff]  }
  0x76   : > { %1268 = vmatpush1.bf16.msra.mxu0 %v4269_v27  ;;  %v298_v27 = vld [vmem:[%s5785_s1 + $0x1b8] sm:$0xff]  ;;  %1066 = vmatprep.subr.bf16.mxu1 %v3409_v25 }
  0x77   : > { %1269 = vmatprep.subr.bf16.mxu0 %v4274_v29  ;;  %v3417_v29 = vcombine.high %v294_v26, %v298_v27  ;;  %v3416_v32 = vcombine.low %v294_v26, %v298_v27  ;;  %923 = vmatmul.mubr.bf16.gmra.mrb[24].mxu1 %v4967_v9 }
  0x78   : > { %932 = vmatprep.mubr.bf16.mxu1 %v4747_v6 }
  0x79   : > { %986 = vmatmul.mubr.bf16.gmra.mrb[36].mxu0 %v4915_v46  ;;  %1067 = vmatpush1.bf16.msra.mxu1 %v3408_v28 }
  0x7a   : > { %995 = vmatprep.mubr.bf16.mxu0 %v4747_v6  ;;  %1270 = vmatpush1.bf16.msra.mxu0 %v4272_v33  ;;  %v3425_v33 = vcombine.high %v302_v30, %v306_v31 }
  0x7b   : > { %1271 = vmatprep.subr.bf16.mxu0 %v4277_v34  ;;  %1068 = vmatprep.subr.bf16.mxu1 %v3417_v29  ;;  %v3424_v34 = vcombine.low %v302_v30, %v306_v31  ;;  %v4309_v29 = vld [vmem:[%s5786_s2 + $0x90] ss:$8 sps:$4 sm:$0xff]   ;;  %v4314_v31 = vld [vmem:[%s5786_s2 + $0xa4] ss:$8 sps:$4 sm:$0xff]  }
  0x7d   : > { %1069 = vmatpush1.bf16.msra.mxu1 %v3416_v32 }
  0x7e   : > { %1272 = vmatpush1.bf16.msra.mxu0 %v4275_v40  ;;  %1070 = vmatprep.subr.bf16.mxu1 %v3425_v33  ;;  %v4294_v40 = vld [vmem:[%s5788_s4 + $0x50] sm:$0xff]  }
  0x7f   : > { %1273 = vmatprep.subr.bf16.mxu0 %v4280_v42  ;;  %933 = vmatmul.mubr.bf16.gmra.mrb[28].mxu1 %v4972_v10  ;;  %v4297_v42 = vld [vmem:[%s5788_s4 + $0x18] sm:$0xff]  }
  0x80   : > { %1088 = vmatprep.mubr.bf16.mxu1 %v4747_v6 }
  0x81   : > { %996 = vmatmul.mubr.bf16.gmra.mrb[40].mxu0 %v4932_v55  ;;  %1071 = vmatpush1.bf16.msra.mxu1 %v3424_v34 }
  0x82   : > { %1005 = vmatprep.mubr.bf16.mxu0 %v4747_v6  ;;  %1274 = vmatpush1.bf16.msra.mxu0 %v4278_v47 }
  0x83   : > { %1275 = vmatprep.subr.bf16.mxu0 %v4283_v48  ;;  %3704 = vmatprep.subr.bf16.mxu1 %v4290_v35 }
  0x86   : > { %1276 = vmatpush1.bf16.msra.mxu0 %v4281_v53 }
  0x87   : > { %1277 = vmatprep.subr.bf16.mxu0 %v4286_v56  ;;  %1089 = vmatmul.mubr.bf16.vlgmr.msra.gmra.mrb[32].mxu1 %v4898_v37 }
  0x88   : > { %3705 = vmatpush3.bf16.msra.mxu1 %v4291_v36  ;;  %1098 = vmatprep.mubr.bf16.mxu1 %v4747_v6 }
  0x89   : > { %1006 = vmatmul.mubr.bf16.gmra.mrb[44].mxu0 %v4949_v0  ;;  %3706 = vmatprep.subr.bf16.mxu1 %v4292_v38 }
  0x8a   : > { %1015 = vmatprep.mubr.bf16.mxu0 %v4747_v6  ;;  %1278 = vmatpush1.bf16.msra.mxu0 %v4284_v60 }
  0x8b   : > { %1279 = vmatprep.subr.bf16.mxu0 %v4289_v61 }
  0x8c   : > { %3707 = vmatpush3.bf16.msra.mxu1 %v4293_v39 }
  0x8d   : > { %3708 = vmatprep.subr.bf16.mxu1 %v4294_v40  ;;  %v4312_v40 = vld [vmem:[%s5786_s2 + $0xa0] ss:$8 sps:$4 sm:$0xff]  }
  0x8e   : > { %1280 = vmatpush1.bf16.msra.mxu0 %v4287_v3 }
  0x8f   : > { %1099 = vmatmul.mubr.bf16.gmra.mrb[36].mxu1 %v4915_v46 }
  0x90   : > { %1108 = vmatprep.mubr.bf16.mxu1 %v4747_v6  ;;  %3709 = vmatpush3.bf16.msra.mxu1 %v4295_v41 }
  0x91   : > { %1016 = vmatmul.mubr.bf16.gmra.mrb[48].mxu0 %v4957_v7 }
  0x92   : > { %1025 = vmatprep.mubr.bf16.mxu0 %v4747_v6 }
  0x97   : > { %1109 = vmatmul.mubr.bf16.gmra.mrb[40].mxu1 %v4932_v55 }
  0x98   : > { %1118 = vmatprep.mubr.bf16.mxu1 %v4747_v6 }
  0x99   : > { %1026 = vmatmul.mubr.bf16.gmra.mrb[52].mxu0 %v4962_v8 }
  0x9a   : > { %1035 = vmatprep.mubr.bf16.mxu0 %v4747_v6 }
  0x9f   : > { %1119 = vmatmul.mubr.bf16.gmra.mrb[44].mxu1 %v4949_v0 }
  0xa0   : > { %1128 = vmatprep.mubr.bf16.mxu1 %v4747_v6 }
  0xa1   : > { %1036 = vmatmul.mubr.bf16.gmra.mrb[56].mxu0 %v4967_v9 }
  0xa2   : > { %1045 = vmatprep.mubr.bf16.mxu0 %v4747_v6 }
  0xa7   : > { %1129 = vmatmul.mubr.bf16.gmra.mrb[48].mxu1 %v4957_v7 }
  0xa8   : > { %1138 = vmatprep.mubr.bf16.mxu1 %v4747_v6 }
  0xa9   : > { %1046 = vmatmul.mubr.bf16.gmra.mrb[60].mxu0 %v4972_v10 }
  0xaa   : > { %1297 = vmatprep.mubr.bf16.mxu0 %v4747_v6 }
  0xaf   : > { %1139 = vmatmul.mubr.bf16.gmra.mrb[52].mxu1 %v4962_v8 }
  0xb0   : > { %1148 = vmatprep.mubr.bf16.mxu1 %v4747_v6 }
  0xb1   : > { %1298 = vmatmul.mubr.bf16.vlgmr.msra.gmra.mrb[0].mxu0 %v4898_v37  ;;  %v4296_v37 = vld [vmem:[%s5788_s4 + $0x58] sm:$0xff]  }
  0xb2   : > { %1307 = vmatprep.mubr.bf16.mxu0 %v4747_v6  ;;  %3710 = vmatprep.subr.bf16.mxu1 %v4296_v37 }
  0xb3   : > { %3711 = vmatpush3.bf16.msra.mxu1 %v4297_v42  ;;  %v4317_v42 = vld [vmem:[%s5786_s2 + $0xb4] ss:$8 sps:$4 sm:$0xff]  }
  0xb4   : > { %3712 = vmatprep.subr.bf16.mxu1 %v4298_v43 }
  0xb7   : > { %3713 = vmatpush3.bf16.msra.mxu1 %v4299_v44 }
  0xb8   : > { %1149 = vmatmul.mubr.bf16.gmra.mrb[56].mxu1 %v4967_v9 }
  0xb9   : > { %1308 = vmatmul.mubr.bf16.gmra.mrb[4].mxu0 %v4915_v46  ;;  %v4300_v46 = vld [vmem:[%s5788_s4 + $0x68] sm:$0xff]   ;;  %1158 = vmatprep.mubr.bf16.mxu1 %v4747_v6 }
  0xba   : > { %1317 = vmatprep.mubr.bf16.mxu0 %v4747_v6  ;;  %3714 = vmatprep.subr.bf16.mxu1 %v4300_v46 }
  0xbb   : > { %3715 = vmatpush3.bf16.msra.mxu1 %v4301_v45 }
  0xc0   : > { %1159 = vmatmul.mubr.bf16.gmra.mrb[60].mxu1 %v4972_v10 }
  0xc1   : > { %1318 = vmatmul.mubr.bf16.gmra.mrb[8].mxu0 %v4932_v55  ;;  %v4302_v55 = vld [vmem:[%s5788_s4 + $0x70] sm:$0xff]  }
  0xc2   : > { %1327 = vmatprep.mubr.bf16.mxu0 %v4747_v6  ;;  %3716 = vmatprep.subr.bf16.mxu1 %v4302_v55  ;;  %v4315_v55 = vld [vmem:[%s5786_s2 + $0xb0] ss:$8 sps:$4 sm:$0xff]  }
  0xc9   : > { %1328 = vmatmul.mubr.bf16.gmra.mrb[12].mxu0 %v4949_v0  ;;  %v4303_v0 = vld [vmem:[%s5788_s4 + $0x30] sm:$0xff]  }
  0xca   : > { %1337 = vmatprep.mubr.bf16.mxu0 %v4747_v6  ;;  %3717 = vmatpush3.bf16.msra.mxu1 %v4303_v0 }
  0xd1   : > { %1338 = vmatmul.mubr.bf16.gmra.mrb[16].mxu0 %v4957_v7  ;;  %v4304_v7 = vld [vmem:[%s5788_s4 + $0x78] sm:$0xff]  }
  0xd2   : > { %1347 = vmatprep.mubr.bf16.mxu0 %v4747_v6  ;;  %3718 = vmatprep.subr.bf16.mxu1 %v4304_v7  ;;  %v4320_v7 = vld [vmem:[%s5786_s2 + $0xc4] ss:$8 sps:$4 sm:$0xff]  }
  0xd9   : > { %1348 = vmatmul.mubr.bf16.gmra.mrb[20].mxu0 %v4962_v8  ;;  %v4305_v8 = vld [vmem:[%s5788_s4 + $0x38] sm:$0xff]  }
  0xda   : > { %1357 = vmatprep.mubr.bf16.mxu0 %v4747_v6  ;;  %3719 = vmatpush3.bf16.msra.mxu1 %v4305_v8 }
  0xe1   : > { %1358 = vmatmul.mubr.bf16.gmra.mrb[24].mxu0 %v4967_v9  ;;  %v4308_v9 = vld [vmem:[%s5786_s2 + $0x84] ss:$8 sps:$4 sm:$0xff]  }
  0xe2   : > { %1367 = vmatprep.mubr.bf16.mxu0 %v4747_v6  ;;  %1788 = vmatprep.subr.bf16.mxu1 %v4308_v9 }
  0xe9   : > { %1368 = vmatmul.mubr.bf16.gmra.mrb[28].mxu0 %v4972_v10  ;;  %v309_v10 = vlaneseq }
  0xeb   : > { %v5230_v47 = vshrl.u32 %v309_v10, 7 }
  0xed   : > { %v311_v48 = vsub.s32 0, %v5230_v47  ;;  %v315_v50 = vsub.s32 1, %v5230_v47 }
  0xef   : > { %v5240_v51 = vrot.slane %v5236_v49, %v311_v48  ;;  %v5243_v52 = vrot.slane %v5236_v49, %v315_v50 }
 0x184   : > { %v1299_v53 = vpop.f32.mrb[0].mxu0 }
 0x185   : > { %v3960_v54 = vadd.f32 %v1299_v53, %v5240_v51  ;;  %v1301_v56 = vpop.f32.mrb[1].mxu0 }
 0x186   : > { %v3961_v57 = vadd.f32 %v1301_v56, %v5243_v52  ;;  %v1303_v58 = vpop.f32.mrb[2].mxu0  ;;  %v4318_v56 = vld [vmem:[%s5786_s2 + $0xc0] ss:$8 sps:$4 sm:$0xff]  }
 0x187   : > { %4426 = vtanh.f32 %v3960_v54  ;;  %v3962_v59 = vadd.f32 %v1303_v58, %v5240_v51  ;;  %v1305_v60 = vpop.f32.mrb[3].mxu0 }
 0x188   : > { %4428 = vtanh.f32 %v3961_v57  ;;  %v3963_v61 = vadd.f32 %v1305_v60, %v5243_v52 }
 0x189   : > { %4430 = vtanh.f32 %v3962_v59  ;;  %v4323_v59 = vld [vmem:[%s5786_s2 + $0xd4] ss:$8 sps:$4 sm:$0xff]  }
 0x18a   : > { %4432 = vtanh.f32 %v3963_v61 }
 0x18c   : > { %v1309_v62 = vpop.f32.mrb[4].mxu0 }
 0x18d   : > { %v3964_v63 = vadd.f32 %v1309_v62, %v5240_v51  ;;  %v1311_v1 = vpop.f32.mrb[5].mxu0 }
 0x18e   : > { %v3965_v2 = vadd.f32 %v1311_v1, %v5243_v52  ;;  %v1313_v3 = vpop.f32.mrb[6].mxu0  ;;  %v4321_v1 = vld [vmem:[%s5786_s2 + $0xd0] ss:$8 sps:$4 sm:$0xff]  }
 0x18f   : > { %4434 = vtanh.f32 %v3964_v63  ;;  %v3966_v4 = vadd.f32 %v1313_v3, %v5240_v51  ;;  %v1315_v5 = vpop.f32.mrb[7].mxu0  ;;  %v4326_v3 = vld [vmem:[%s5786_s2 + $0xe4] ss:$8 sps:$4 sm:$0xff]  }
 0x190   : > { %4436 = vtanh.f32 %v3965_v2  ;;  %v3967_v11 = vadd.f32 %v1315_v5, %v5243_v52 }
 0x191   : > { %v4427_v12 = vpop.eup %4426  ;;  %4438 = vtanh.f32 %v3966_v4 }
 0x192   : > { %v4429_v13 = vpop.eup %4428  ;;  %4440 = vtanh.f32 %v3967_v11 }
 0x193   : > { %v4431_v14 = vpop.eup %4430 }
 0x194   : > { %v4433_v15 = vpop.eup %4432  ;;  %v1319_v16 = vpop.f32.mrb[8].mxu0  ;;  %v1442_v17 = vpack.c.bf16 %v4431_v14, %v4427_v12 }
 0x195   : > { %v3968_v18 = vadd.f32 %v1319_v16, %v5240_v51  ;;  %v1321_v19 = vpop.f32.mrb[9].mxu0  ;;  %v1443_v20 = vpack.c.bf16 %v4433_v15, %v4429_v13  ;;  %v4324_v16 = vld [vmem:[%s5786_s2 + $0xe0] ss:$8 sps:$4 sm:$0xff]  }
 0x196   : > { %v3969_v22 = vadd.f32 %v1321_v19, %v5243_v52  ;;  %v1323_v23 = vpop.f32.mrb[10].mxu0 }
 0x197   : > { %4442 = vtanh.f32 %v3968_v18  ;;  %v3970_v25 = vadd.f32 %v1323_v23, %v5240_v51  ;;  %v1325_v26 = vpop.f32.mrb[11].mxu0  ;;  %1618 = vmatprep.mubr.bf16.mxu1 %v1443_v20 }
 0x198   : > { %4444 = vtanh.f32 %v3969_v22  ;;  %v3971_v27 = vadd.f32 %v1325_v26, %v5243_v52  ;;  %1619 = vmatmul.mubr.bf16.vlgmr.msra.gmra.mrb[64].mxu1 %v1442_v17 }
 0x199   : > { %v4435_v28 = vpop.eup %4434  ;;  %4446 = vtanh.f32 %v3970_v25  ;;  %1789 = vmatpush1.bf16.msra.mxu1 %v4306_v21 }
 0x19a   : > { %v4437_v30 = vpop.eup %4436  ;;  %4448 = vtanh.f32 %v3971_v27  ;;  %1790 = vmatprep.subr.bf16.mxu1 %v4311_v24 }
 0x19b   : > { %v4439_v32 = vpop.eup %4438 }
 0x19c   : > { %v4441_v33 = vpop.eup %4440  ;;  %v1329_v34 = vpop.f32.mrb[12].mxu0  ;;  %v1444_v35 = vpack.c.bf16 %v4439_v32, %v4435_v28 }
 0x19d   : > { %v3972_v36 = vadd.f32 %v1329_v34, %v5240_v51  ;;  %v1331_v38 = vpop.f32.mrb[13].mxu0  ;;  %v1445_v39 = vpack.c.bf16 %v4441_v33, %v4437_v30  ;;  %1791 = vmatpush1.bf16.msra.mxu1 %v4309_v29 }
 0x19e   : > { %v3973_v41 = vadd.f32 %v1331_v38, %v5243_v52  ;;  %v1333_v37 = vpop.f32.mrb[14].mxu0  ;;  %1792 = vmatprep.subr.bf16.mxu1 %v4314_v31 }
 0x19f   : > { %4450 = vtanh.f32 %v3972_v36  ;;  %v3974_v43 = vadd.f32 %v1333_v37, %v5240_v51  ;;  %v1335_v44 = vpop.f32.mrb[15].mxu0  ;;  %1626 = vmatprep.mubr.bf16.mxu1 %v1445_v39 }
 0x1a0   : > { %4452 = vtanh.f32 %v3973_v41  ;;  %v3975_v46 = vadd.f32 %v1335_v44, %v5243_v52  ;;  %1627 = vmatmul.mubr.bf16.gmra.mrb[68].mxu1 %v1444_v35 }
 0x1a1   : > { %v4443_v45 = vpop.eup %4442  ;;  %4454 = vtanh.f32 %v3974_v43  ;;  %1793 = vmatpush1.bf16.msra.mxu1 %v4312_v40 }
 0x1a2   : > { %v4445_v0 = vpop.eup %4444  ;;  %4456 = vtanh.f32 %v3975_v46  ;;  %1794 = vmatprep.subr.bf16.mxu1 %v4317_v42 }
 0x1a3   : > { %v4447_v8 = vpop.eup %4446 }
 0x1a4   : > { %v4449_v9 = vpop.eup %4448  ;;  %v1339_v10 = vpop.f32.mrb[16].mxu0  ;;  %v1446_v48 = vpack.c.bf16 %v4447_v8, %v4443_v45 }
 0x1a5   : > { %v3976_v50 = vadd.f32 %v1339_v10, %v5240_v51  ;;  %v1341_v53 = vpop.f32.mrb[17].mxu0  ;;  %v1447_v54 = vpack.c.bf16 %v4449_v9, %v4445_v0  ;;  %1795 = vmatpush1.bf16.msra.mxu1 %v4315_v55 }
 0x1a6   : > { %v3977_v57 = vadd.f32 %v1341_v53, %v5243_v52  ;;  %v1343_v58 = vpop.f32.mrb[18].mxu0  ;;  %1796 = vmatprep.subr.bf16.mxu1 %v4320_v7 }
 0x1a7   : > { %4458 = vtanh.f32 %v3976_v50  ;;  %v3978_v60 = vadd.f32 %v1343_v58, %v5240_v51  ;;  %v1345_v61 = vpop.f32.mrb[19].mxu0  ;;  %1634 = vmatprep.mubr.bf16.mxu1 %v1447_v54 }
 0x1a8   : > { %4460 = vtanh.f32 %v3977_v57  ;;  %v3979_v62 = vadd.f32 %v1345_v61, %v5243_v52  ;;  %1635 = vmatmul.mubr.bf16.gmra.mrb[72].mxu1 %v1446_v48  ;;  %v4330_v61 = vld [vmem:[%s5788_s4 + $0xc0] sm:$0xff]  }
 0x1a9   : > { %v4451_v63 = vpop.eup %4450  ;;  %4462 = vtanh.f32 %v3978_v60  ;;  %1797 = vmatpush1.bf16.msra.mxu1 %v4318_v56  ;;  %v4329_v60 = vld [vmem:[%s5786_s2 + $0xf4] ss:$8 sps:$4 sm:$0xff]   ;;  %3768 = vmatprep.subr.bf16.mxu0 %v4330_v61 }
 0x1aa   : > { %v4453_v2 = vpop.eup %4452  ;;  %4464 = vtanh.f32 %v3979_v62  ;;  %1798 = vmatprep.subr.bf16.mxu1 %v4323_v59  ;;  %v4331_v62 = vld [vmem:[%s5788_s4 + $0x80] sm:$0xff]  }
 0x1ab   : > { %v4455_v4 = vpop.eup %4454  ;;  %3769 = vmatpush3.bf16.msra.mxu0 %v4331_v62 }
 0x1ac   : > { %v4457_v5 = vpop.eup %4456  ;;  %v1349_v11 = vpop.f32.mrb[20].mxu0  ;;  %v1448_v12 = vpack.c.bf16 %v4455_v4, %v4451_v63  ;;  %v4332_v63 = vld [vmem:[%s5788_s4 + $0xc8] sm:$0xff]   ;;  %v4336_v4 = vld [vmem:[%s5788_s4 + $0xd8] sm:$0xff]  }
 0x1ad   : > { %v3980_v13 = vadd.f32 %v1349_v11, %v5240_v51  ;;  %v1351_v14 = vpop.f32.mrb[21].mxu0  ;;  %v1449_v15 = vpack.c.bf16 %v4457_v5, %v4453_v2  ;;  %1799 = vmatpush1.bf16.msra.mxu1 %v4321_v1  ;;  %v4333_v1 = vld [vmem:[%s5788_s4 + $0x88] sm:$0xff]   ;;  %3770 = vmatprep.subr.bf16.mxu0 %v4332_v63  ;;  %v4334_v2 = vld [vmem:[%s5788_s4 + $0xd0] sm:$0xff]   ;;  %v4337_v5 = vld [vmem:[%s5788_s4 + $0x98] sm:$0xff]  }
 0x1ae   : > { %v3981_v17 = vadd.f32 %v1351_v14, %v5243_v52  ;;  %v1353_v18 = vpop.f32.mrb[22].mxu0  ;;  %1800 = vmatprep.subr.bf16.mxu1 %v4326_v3  ;;  %v4335_v3 = vld [vmem:[%s5788_s4 + $0x90] sm:$0xff]   ;;  %v4338_v11 = vld [vmem:[%s5788_s4 + $0xe0] sm:$0xff]   ;;  %v4341_v14 = vld [vmem:[%s5788_s4 + $0xa8] sm:$0xff]  }
 0x1af   : > { %4466 = vtanh.f32 %v3980_v13  ;;  %v3982_v19 = vadd.f32 %v1353_v18, %v5240_v51  ;;  %v1355_v20 = vpop.f32.mrb[23].mxu0  ;;  %1642 = vmatprep.mubr.bf16.mxu1 %v1449_v15  ;;  %3771 = vmatpush3.bf16.msra.mxu0 %v4333_v1  ;;  %v4340_v13 = vld [vmem:[%s5788_s4 + $0xe8] sm:$0xff]  }
 0x1b0   : > { %4468 = vtanh.f32 %v3981_v17  ;;  %v3983_v21 = vadd.f32 %v1355_v20, %v5243_v52  ;;  %1643 = vmatmul.mubr.bf16.gmra.mrb[76].mxu1 %v1448_v12  ;;  %3772 = vmatprep.subr.bf16.mxu0 %v4334_v2  ;;  %v4339_v12 = vld [vmem:[%s5788_s4 + $0xa0] sm:$0xff]  }
 0x1b1   : > { %v4459_v22 = vpop.eup %4458  ;;  %4470 = vtanh.f32 %v3982_v19  ;;  %1801 = vmatpush1.bf16.msra.mxu1 %v4324_v16 }
 0x1b2   : > { %v4461_v23 = vpop.eup %4460  ;;  %4472 = vtanh.f32 %v3983_v21  ;;  %1802 = vmatprep.subr.bf16.mxu1 %v4329_v60 }
 0x1b3   : > { %v4463_v24 = vpop.eup %4462  ;;  %3773 = vmatpush3.bf16.msra.mxu0 %v4335_v3 }
 0x1b4   : > { %v4465_v25 = vpop.eup %4464  ;;  %v1359_v26 = vpop.f32.mrb[24].mxu0  ;;  %v1450_v27 = vpack.c.bf16 %v4463_v24, %v4459_v22  ;;  %3774 = vmatprep.subr.bf16.mxu0 %v4336_v4 }
 0x1b5   : > { %v3984_v28 = vadd.f32 %v1359_v26, %v5240_v51  ;;  %v1361_v29 = vpop.f32.mrb[25].mxu0  ;;  %v1451_v30 = vpack.c.bf16 %v4465_v25, %v4461_v23 }
 0x1b6   : > { %v3985_v31 = vadd.f32 %v1361_v29, %v5243_v52  ;;  %v1363_v32 = vpop.f32.mrb[26].mxu0 }
 0x1b7   : > { %4474 = vtanh.f32 %v3984_v28  ;;  %v3986_v33 = vadd.f32 %v1363_v32, %v5240_v51  ;;  %v1365_v34 = vpop.f32.mrb[27].mxu0  ;;  %1650 = vmatprep.mubr.bf16.mxu1 %v1451_v30  ;;  %3775 = vmatpush3.bf16.msra.mxu0 %v4337_v5  ;;  %v4342_v5 = vld [vmem:[%s5788_s4 + $0xf0] sm:$0xff]  }
 0x1b8   : > { %4476 = vtanh.f32 %v3985_v31  ;;  %v3987_v35 = vadd.f32 %v1365_v34, %v5243_v52  ;;  %1651 = vmatmul.mubr.bf16.gmra.mrb[80].mxu1 %v1450_v27  ;;  %3776 = vmatprep.subr.bf16.mxu0 %v4338_v11  ;;  %v4343_v11 = vld [vmem:[%s5788_s4 + $0xb0] sm:$0xff]  }
 0x1b9   : > { %v4467_v36 = vpop.eup %4466  ;;  %4478 = vtanh.f32 %v3986_v33 }
 0x1ba   : > { %v4469_v38 = vpop.eup %4468  ;;  %4480 = vtanh.f32 %v3987_v35 }
 0x1bb   : > { %v4471_v39 = vpop.eup %4470  ;;  %3777 = vmatpush3.bf16.msra.mxu0 %v4339_v12  ;;  %v4344_v12 = vld [vmem:[%s5788_s4 + $0xf8] sm:$0xff]  }
 0x1bc   : > { %v4473_v40 = vpop.eup %4472  ;;  %v1369_v41 = vpop.f32.mrb[28].mxu0  ;;  %v1452_v37 = vpack.c.bf16 %v4471_v39, %v4467_v36  ;;  %3778 = vmatprep.subr.bf16.mxu0 %v4340_v13  ;;  %v4345_v13 = vld [vmem:[%s5788_s4 + $0xb8] sm:$0xff]  }
 0x1bd   : > { %v3988_v42 = vadd.f32 %v1369_v41, %v5240_v51  ;;  %v1371_v43 = vpop.f32.mrb[29].mxu0  ;;  %v1453_v44 = vpack.c.bf16 %v4473_v40, %v4469_v38 }
 0x1be   : > { %v3989_v46 = vadd.f32 %v1371_v43, %v5243_v52  ;;  %v1373_v45 = vpop.f32.mrb[30].mxu0 }
 0x1bf   : > { %4482 = vtanh.f32 %v3988_v42  ;;  %v3990_v55 = vadd.f32 %v1373_v45, %v5240_v51  ;;  %v1375_v0 = vpop.f32.mrb[31].mxu0  ;;  %1658 = vmatprep.mubr.bf16.mxu1 %v1453_v44  ;;  %3779 = vmatpush3.bf16.msra.mxu0 %v4341_v14  ;;  %v4348_v14 = vld [vmem:[%s5786_s2 + $0x104] ss:$8 sps:$4 sm:$0xff]  }
 0x1c0   : > { %4484 = vtanh.f32 %v3989_v46  ;;  %v3991_v7 = vadd.f32 %v1375_v0, %v5243_v52  ;;  %1659 = vmatmul.mubr.bf16.gmra.mrb[84].mxu1 %v1452_v37  ;;  %v4327_v52 = vld [vmem:[%s5786_s2 + $0xf0] ss:$8 sps:$4 sm:$0xff]   ;;  %3780 = vmatprep.subr.bf16.mxu0 %v4342_v5  ;;  %v4360_v5 = vld [vmem:[%s5786_s2 + $0x144] ss:$8 sps:$4 sm:$0xff]  }
 0x1c1   : > { %v4475_v8 = vpop.eup %4474  ;;  %4486 = vtanh.f32 %v3990_v55  ;;  %1803 = vmatpush1.bf16.msra.mxu1 %v4327_v52 }
 0x1c2   : > { %v4477_v9 = vpop.eup %4476  ;;  %4488 = vtanh.f32 %v3991_v7 }
 0x1c3   : > { %v4479_v10 = vpop.eup %4478  ;;  %3781 = vmatpush3.bf16.msra.mxu0 %v4343_v11 }
 0x1c4   : > { %v4481_v48 = vpop.eup %4480  ;;  %v1454_v50 = vpack.c.bf16 %v4479_v10, %v4475_v8  ;;  %3782 = vmatprep.subr.bf16.mxu0 %v4344_v12 }
 0x1c5   : > { %v1455_v53 = vpack.c.bf16 %v4481_v48, %v4477_v9 }
 0x1c7   : > { %1666 = vmatprep.mubr.bf16.mxu1 %v1455_v53  ;;  %3783 = vmatpush3.bf16.msra.mxu0 %v4345_v13 }
 0x1c8   : > { %1667 = vmatmul.mubr.bf16.gmra.mrb[88].mxu1 %v1454_v50  ;;  %2312 = vmatprep.subr.bf16.mxu0 %v4348_v14 }
 0x1c9   : > { %v4483_v54 = vpop.eup %4482 }
 0x1ca   : > { %v4485_v56 = vpop.eup %4484 }
 0x1cb   : > { %v4487_v57 = vpop.eup %4486 }
 0x1cc   : > { %v4489_v51 = vpop.eup %4488  ;;  %v1456_v58 = vpack.c.bf16 %v4487_v57, %v4483_v54 }
 0x1cd   : > { %v1457_v59 = vpack.c.bf16 %v4489_v51, %v4485_v56 }
 0x1cf   : > { %1674 = vmatprep.mubr.bf16.mxu1 %v1457_v59 }
 0x1d0   : > { %1675 = vmatmul.mubr.bf16.gmra.mrb[92].mxu1 %v1456_v58 }
 0x1d1   : > { %1820 = vmatprep.mubr.bf16.mxu1 %v4747_v6 }
 0x26b   : > { %v3720_v15 = vpop.f32.mrb[64].mxu1 }
 0x26c   : > { %v3721_v16 = vpop.f32.mrb[65].mxu1 }
 0x26d   : > { %v3722_v17 = vadd.f32 %v3721_v16, %v3720_v15  ;;  %v3723_v18 = vpop.f32.mrb[66].mxu1  ;;  %v319_v15 = vsub.s32 2, %v5230_v47  ;;  %v323_v16 = vsub.s32 3, %v5230_v47 }
 0x26e   : > { %v3724_v19 = vpop.f32.mrb[67].mxu1 }
 0x26f   : > { %v3725_v20 = vadd.f32 %v3724_v19, %v3723_v18  ;;  %v5387_v18 = vrot.slane %v5236_v49, %v323_v16 }
 0x271   : > { %v1683_v21 = vpack.c.bf16 %v3725_v20, %v3722_v17  ;;  %v5384_v17 = vrot.slane %v5236_v49, %v319_v15 }
 0x273   : > { %v3726_v22 = vpop.f32.mrb[68].mxu1  ;;  %1821 = vmatmul.mubr.bf16.vlgmr.msra.gmra.mrb[0].mxu1 %v1683_v21 }
 0x274   : > { %v3727_v23 = vpop.f32.mrb[69].mxu1  ;;  %1830 = vmatprep.mubr.bf16.mxu1 %v4747_v6 }
 0x275   : > { %v3728_v24 = vadd.f32 %v3727_v23, %v3726_v22  ;;  %v3729_v25 = vpop.f32.mrb[70].mxu1 }
 0x276   : > { %v3730_v26 = vpop.f32.mrb[71].mxu1 }
 0x277   : > { %v3731_v27 = vadd.f32 %v3730_v26, %v3729_v25 }
 0x279   : > { %v1684_v28 = vpack.c.bf16 %v3731_v27, %v3728_v24 }
 0x27b   : > { %v3732_v29 = vpop.f32.mrb[72].mxu1  ;;  %1831 = vmatmul.mubr.bf16.gmra.mrb[4].mxu1 %v1684_v28 }
 0x27c   : > { %v3733_v30 = vpop.f32.mrb[73].mxu1  ;;  %1840 = vmatprep.mubr.bf16.mxu1 %v4747_v6 }
 0x27d   : > { %v3734_v31 = vadd.f32 %v3733_v30, %v3732_v29  ;;  %v3735_v32 = vpop.f32.mrb[74].mxu1 }
 0x27e   : > { %v3736_v33 = vpop.f32.mrb[75].mxu1 }
 0x27f   : > { %v3737_v34 = vadd.f32 %v3736_v33, %v3735_v32 }
 0x281   : > { %v1685_v35 = vpack.c.bf16 %v3737_v34, %v3734_v31 }
 0x283   : > { %v3738_v36 = vpop.f32.mrb[76].mxu1  ;;  %1841 = vmatmul.mubr.bf16.gmra.mrb[8].mxu1 %v1685_v35 }
 0x284   : > { %v3739_v38 = vpop.f32.mrb[77].mxu1  ;;  %1850 = vmatprep.mubr.bf16.mxu1 %v4747_v6 }
 0x285   : > { %v3740_v39 = vadd.f32 %v3739_v38, %v3738_v36  ;;  %v3741_v40 = vpop.f32.mrb[78].mxu1 }
 0x286   : > { %v3742_v41 = vpop.f32.mrb[79].mxu1 }
 0x287   : > { %v3743_v37 = vadd.f32 %v3742_v41, %v3741_v40 }
 0x289   : > { %v1686_v42 = vpack.c.bf16 %v3743_v37, %v3740_v39 }
 0x28b   : > { %v3744_v43 = vpop.f32.mrb[80].mxu1  ;;  %1851 = vmatmul.mubr.bf16.gmra.mrb[12].mxu1 %v1686_v42 }
 0x28c   : > { %v3745_v44 = vpop.f32.mrb[81].mxu1  ;;  %1860 = vmatprep.mubr.bf16.mxu1 %v4747_v6 }
 0x28d   : > { %v3746_v46 = vadd.f32 %v3745_v44, %v3744_v43  ;;  %v3747_v45 = vpop.f32.mrb[82].mxu1  ;;  %v4346_v43 = vld [vmem:[%s5786_s2 + $0x100] ss:$8 sps:$4 sm:$0xff]  }
 0x28e   : > { %v3748_v55 = vpop.f32.mrb[83].mxu1 }
 0x28f   : > { %v3749_v0 = vadd.f32 %v3748_v55, %v3747_v45  ;;  %v4351_v45 = vld [vmem:[%s5786_s2 + $0x114] ss:$8 sps:$4 sm:$0xff]  }
 0x291   : > { %v1687_v7 = vpack.c.bf16 %v3749_v0, %v3746_v46 }
 0x293   : > { %v3750_v8 = vpop.f32.mrb[84].mxu1  ;;  %1861 = vmatmul.mubr.bf16.gmra.mrb[16].mxu1 %v1687_v7 }
 0x294   : > { %v3751_v9 = vpop.f32.mrb[85].mxu1  ;;  %1870 = vmatprep.mubr.bf16.mxu1 %v4747_v6 }
 0x295   : > { %v3752_v10 = vadd.f32 %v3751_v9, %v3750_v8  ;;  %v3753_v48 = vpop.f32.mrb[86].mxu1  ;;  %v4349_v9 = vld [vmem:[%s5786_s2 + $0x110] ss:$8 sps:$4 sm:$0xff]  }
 0x296   : > { %v3754_v50 = vpop.f32.mrb[87].mxu1 }
 0x297   : > { %v3755_v53 = vadd.f32 %v3754_v50, %v3753_v48  ;;  %v4354_v48 = vld [vmem:[%s5786_s2 + $0x124] ss:$8 sps:$4 sm:$0xff]  }
 0x299   : > { %v1688_v54 = vpack.c.bf16 %v3755_v53, %v3752_v10 }
 0x29b   : > { %v3756_v56 = vpop.f32.mrb[88].mxu1  ;;  %1871 = vmatmul.mubr.bf16.gmra.mrb[20].mxu1 %v1688_v54 }
 0x29c   : > { %v3757_v57 = vpop.f32.mrb[89].mxu1  ;;  %1880 = vmatprep.mubr.bf16.mxu1 %v4747_v6 }
 0x29d   : > { %v3758_v51 = vadd.f32 %v3757_v57, %v3756_v56  ;;  %v3759_v58 = vpop.f32.mrb[90].mxu1 }
 0x29e   : > { %v3760_v59 = vpop.f32.mrb[91].mxu1 }
 0x29f   : > { %v3761_v52 = vadd.f32 %v3760_v59, %v3759_v58  ;;  %v4352_v59 = vld [vmem:[%s5786_s2 + $0x120] ss:$8 sps:$4 sm:$0xff]  }
 0x2a1   : > { %v1689_v60 = vpack.c.bf16 %v3761_v52, %v3758_v51 }
 0x2a3   : > { %v3762_v61 = vpop.f32.mrb[92].mxu1  ;;  %1881 = vmatmul.mubr.bf16.gmra.mrb[24].mxu1 %v1689_v60 }
 0x2a4   : > { %v3763_v62 = vpop.f32.mrb[93].mxu1  ;;  %1890 = vmatprep.mubr.bf16.mxu1 %v4747_v6 }
 0x2a5   : > { %v3764_v63 = vadd.f32 %v3763_v62, %v3762_v61  ;;  %v3765_v1 = vpop.f32.mrb[94].mxu1  ;;  %v4357_v61 = vld [vmem:[%s5786_s2 + $0x134] ss:$8 sps:$4 sm:$0xff]  }
 0x2a6   : > { %v3766_v2 = vpop.f32.mrb[95].mxu1 }
 0x2a7   : > { %v3767_v3 = vadd.f32 %v3766_v2, %v3765_v1 }
 0x2a9   : > { %v1690_v4 = vpack.c.bf16 %v3767_v3, %v3764_v63  ;;  %v4355_v3 = vld [vmem:[%s5786_s2 + $0x130] ss:$8 sps:$4 sm:$0xff]  }
 0x2ab   : > { %1891 = vmatmul.mubr.bf16.gmra.mrb[28].mxu1 %v1690_v4 }
 0x346   : > { %v1822_v19 = vpop.f32.mrb[0].mxu1 }
 0x347   : > { %v3992_v20 = vadd.f32 %v1822_v19, %v5384_v17  ;;  %v1824_v21 = vpop.f32.mrb[1].mxu1 }
 0x348   : > { %v3993_v22 = vadd.f32 %v1824_v21, %v5387_v18  ;;  %v1826_v23 = vpop.f32.mrb[2].mxu1 }
 0x349   : > { %4490 = vtanh.f32 %v3992_v20  ;;  %v3994_v24 = vadd.f32 %v1826_v23, %v5384_v17  ;;  %v1828_v25 = vpop.f32.mrb[3].mxu1  ;;  %v4358_v20 = vld [vmem:[%s5786_s2 + $0x140] ss:$8 sps:$4 sm:$0xff]   ;;  %v4363_v23 = vld [vmem:[%s5786_s2 + $0x154] ss:$8 sps:$4 sm:$0xff]  }
 0x34a   : > { %4492 = vtanh.f32 %v3993_v22  ;;  %v3995_v26 = vadd.f32 %v1828_v25, %v5387_v18 }
 0x34b   : > { %4494 = vtanh.f32 %v3994_v24 }
 0x34c   : > { %4496 = vtanh.f32 %v3995_v26 }
 0x34e   : > { %v1832_v27 = vpop.f32.mrb[4].mxu1 }
 0x34f   : > { %v3996_v49 = vadd.f32 %v1832_v27, %v5384_v17  ;;  %v1834_v28 = vpop.f32.mrb[5].mxu1 }
 0x350   : > { %v3997_v29 = vadd.f32 %v1834_v28, %v5387_v18  ;;  %v1836_v30 = vpop.f32.mrb[6].mxu1 }
 0x351   : > { %4498 = vtanh.f32 %v3996_v49  ;;  %v3998_v31 = vadd.f32 %v1836_v30, %v5384_v17  ;;  %v1838_v32 = vpop.f32.mrb[7].mxu1  ;;  %v4361_v49 = vld [vmem:[%s5786_s2 + $0x150] ss:$8 sps:$4 sm:$0xff]  }
 0x352   : > { %4500 = vtanh.f32 %v3997_v29  ;;  %v3999_v33 = vadd.f32 %v1838_v32, %v5387_v18  ;;  %v4366_v29 = vld [vmem:[%s5786_s2 + $0x164] ss:$8 sps:$4 sm:$0xff]  }
 0x353   : > { %v4491_v34 = vpop.eup %4490  ;;  %4502 = vtanh.f32 %v3998_v31 }
 0x354   : > { %v4493_v35 = vpop.eup %4492  ;;  %4504 = vtanh.f32 %v3999_v33 }
 0x355   : > { %v4495_v36 = vpop.eup %4494 }
 0x356   : > { %v4497_v38 = vpop.eup %4496  ;;  %v1842_v39 = vpop.f32.mrb[8].mxu1  ;;  %v1965_v40 = vpack.c.bf16 %v4495_v36, %v4491_v34 }
 0x357   : > { %v4000_v41 = vadd.f32 %v1842_v39, %v5384_v17  ;;  %v1844_v37 = vpop.f32.mrb[9].mxu1  ;;  %v1966_v42 = vpack.c.bf16 %v4497_v38, %v4493_v35  ;;  %v4364_v38 = vld [vmem:[%s5786_s2 + $0x160] ss:$8 sps:$4 sm:$0xff]  }
 0x358   : > { %v4001_v44 = vadd.f32 %v1844_v37, %v5387_v18  ;;  %v1846_v46 = vpop.f32.mrb[10].mxu1 }
 0x359   : > { %4506 = vtanh.f32 %v4000_v41  ;;  %v4002_v55 = vadd.f32 %v1846_v46, %v5384_v17  ;;  %v1848_v0 = vpop.f32.mrb[11].mxu1  ;;  %2142 = vmatprep.mubr.bf16.mxu0 %v1966_v42 }
 0x35a   : > { %4508 = vtanh.f32 %v4001_v44  ;;  %v4003_v7 = vadd.f32 %v1848_v0, %v5387_v18  ;;  %2143 = vmatmul.mubr.bf16.vlgmr.msra.gmra.mrb[64].mxu0 %v1965_v40 }
 0x35b   : > { %v4499_v8 = vpop.eup %4498  ;;  %4510 = vtanh.f32 %v4002_v55  ;;  %2313 = vmatpush1.bf16.msra.mxu0 %v4346_v43 }
 0x35c   : > { %v4501_v10 = vpop.eup %4500  ;;  %4512 = vtanh.f32 %v4003_v7  ;;  %2314 = vmatprep.subr.bf16.mxu0 %v4351_v45 }
 0x35d   : > { %v4503_v50 = vpop.eup %4502 }
 0x35e   : > { %v4505_v53 = vpop.eup %4504  ;;  %v1852_v54 = vpop.f32.mrb[12].mxu1  ;;  %v1967_v56 = vpack.c.bf16 %v4503_v50, %v4499_v8 }
 0x35f   : > { %v4004_v57 = vadd.f32 %v1852_v54, %v5384_v17  ;;  %v1854_v51 = vpop.f32.mrb[13].mxu1  ;;  %v1968_v58 = vpack.c.bf16 %v4505_v53, %v4501_v10  ;;  %2315 = vmatpush1.bf16.msra.mxu0 %v4349_v9 }
 0x360   : > { %v4005_v52 = vadd.f32 %v1854_v51, %v5387_v18  ;;  %v1856_v60 = vpop.f32.mrb[14].mxu1  ;;  %2316 = vmatprep.subr.bf16.mxu0 %v4354_v48 }
 0x361   : > { %4514 = vtanh.f32 %v4004_v57  ;;  %v4006_v62 = vadd.f32 %v1856_v60, %v5384_v17  ;;  %v1858_v63 = vpop.f32.mrb[15].mxu1  ;;  %2150 = vmatprep.mubr.bf16.mxu0 %v1968_v58 }
 0x362   : > { %4516 = vtanh.f32 %v4005_v52  ;;  %v4007_v1 = vadd.f32 %v1858_v63, %v5387_v18  ;;  %2151 = vmatmul.mubr.bf16.gmra.mrb[68].mxu0 %v1967_v56 }
 0x363   : > { %v4507_v2 = vpop.eup %4506  ;;  %4518 = vtanh.f32 %v4006_v62  ;;  %2317 = vmatpush1.bf16.msra.mxu0 %v4352_v59 }
 0x364   : > { %v4509_v4 = vpop.eup %4508  ;;  %4520 = vtanh.f32 %v4007_v1  ;;  %2318 = vmatprep.subr.bf16.mxu0 %v4357_v61 }
 0x365   : > { %v4511_v11 = vpop.eup %4510 }
 0x366   : > { %v4513_v12 = vpop.eup %4512  ;;  %v1862_v13 = vpop.f32.mrb[16].mxu1  ;;  %v1969_v14 = vpack.c.bf16 %v4511_v11, %v4507_v2 }
 0x367   : > { %v4008_v15 = vadd.f32 %v1862_v13, %v5384_v17  ;;  %v1864_v16 = vpop.f32.mrb[17].mxu1  ;;  %v1970_v19 = vpack.c.bf16 %v4513_v12, %v4509_v4  ;;  %2319 = vmatpush1.bf16.msra.mxu0 %v4355_v3 }
 0x368   : > { %v4009_v21 = vadd.f32 %v1864_v16, %v5387_v18  ;;  %v1866_v22 = vpop.f32.mrb[18].mxu1  ;;  %2320 = vmatprep.subr.bf16.mxu0 %v4360_v5 }
 0x369   : > { %4522 = vtanh.f32 %v4008_v15  ;;  %v4010_v24 = vadd.f32 %v1866_v22, %v5384_v17  ;;  %v1868_v25 = vpop.f32.mrb[19].mxu1  ;;  %2158 = vmatprep.mubr.bf16.mxu0 %v1970_v19 }
 0x36a   : > { %4524 = vtanh.f32 %v4009_v21  ;;  %v4011_v26 = vadd.f32 %v1868_v25, %v5387_v18  ;;  %2159 = vmatmul.mubr.bf16.gmra.mrb[72].mxu0 %v1969_v14  ;;  %v4371_v25 = vld [vmem:[%s5788_s4 + $0x100] sm:$0xff]  }
 0x36b   : > { %v4515_v27 = vpop.eup %4514  ;;  %4526 = vtanh.f32 %v4010_v24  ;;  %2321 = vmatpush1.bf16.msra.mxu0 %v4358_v20  ;;  %v4370_v24 = vld [vmem:[%s5788_s4 + $0x140] sm:$0xff]  }
 0x36c   : > { %v4517_v28 = vpop.eup %4516  ;;  %4528 = vtanh.f32 %v4011_v26  ;;  %2322 = vmatprep.subr.bf16.mxu0 %v4363_v23  ;;  %v4369_v23 = vld [vmem:[%s5786_s2 + $0x174] ss:$8 sps:$4 sm:$0xff]   ;;  %v4372_v26 = vld [vmem:[%s5788_s4 + $0x148] sm:$0xff]   ;;  %3832 = vmatprep.subr.bf16.mxu1 %v4370_v24 }
 0x36d   : > { %v4519_v30 = vpop.eup %4518  ;;  %3833 = vmatpush3.bf16.msra.mxu1 %v4371_v25 }
 0x36e   : > { %v4521_v31 = vpop.eup %4520  ;;  %v1872_v32 = vpop.f32.mrb[20].mxu1  ;;  %v1971_v33 = vpack.c.bf16 %v4519_v30, %v4515_v27  ;;  %v4373_v27 = vld [vmem:[%s5788_s4 + $0x108] sm:$0xff]   ;;  %3834 = vmatprep.subr.bf16.mxu1 %v4372_v26  ;;  %v4377_v30 = vld [vmem:[%s5788_s4 + $0x118] sm:$0xff]  }
 0x36f   : > { %v4012_v34 = vadd.f32 %v1872_v32, %v5384_v17  ;;  %v1874_v35 = vpop.f32.mrb[21].mxu1  ;;  %v1972_v36 = vpack.c.bf16 %v4521_v31, %v4517_v28  ;;  %2323 = vmatpush1.bf16.msra.mxu0 %v4361_v49  ;;  %v4374_v49 = vld [vmem:[%s5788_s4 + $0x150] sm:$0xff]   ;;  %v4378_v31 = vld [vmem:[%s5788_s4 + $0x160] sm:$0xff]  }
 0x370   : > { %v4013_v39 = vadd.f32 %v1874_v35, %v5387_v18  ;;  %v1876_v40 = vpop.f32.mrb[22].mxu1  ;;  %2324 = vmatprep.subr.bf16.mxu0 %v4366_v29  ;;  %v4375_v28 = vld [vmem:[%s5788_s4 + $0x110] sm:$0xff]   ;;  %v4376_v29 = vld [vmem:[%s5788_s4 + $0x158] sm:$0xff]   ;;  %v4379_v32 = vld [vmem:[%s5788_s4 + $0x120] sm:$0xff]  }
 0x371   : > { %4530 = vtanh.f32 %v4012_v34  ;;  %v4014_v41 = vadd.f32 %v1876_v40, %v5384_v17  ;;  %v1878_v37 = vpop.f32.mrb[23].mxu1  ;;  %2166 = vmatprep.mubr.bf16.mxu0 %v1972_v36  ;;  %3835 = vmatpush3.bf16.msra.mxu1 %v4373_v27  ;;  %v4381_v34 = vld [vmem:[%s5788_s4 + $0x128] sm:$0xff]  }
 0x372   : > { %4532 = vtanh.f32 %v4013_v39  ;;  %v4015_v42 = vadd.f32 %v1878_v37, %v5387_v18  ;;  %2167 = vmatmul.mubr.bf16.gmra.mrb[76].mxu0 %v1971_v33  ;;  %3836 = vmatprep.subr.bf16.mxu1 %v4374_v49  ;;  %v4380_v33 = vld [vmem:[%s5788_s4 + $0x168] sm:$0xff]  }
 0x373   : > { %v4523_v43 = vpop.eup %4522  ;;  %4534 = vtanh.f32 %v4014_v41  ;;  %2325 = vmatpush1.bf16.msra.mxu0 %v4364_v38 }
 0x374   : > { %v4525_v44 = vpop.eup %4524  ;;  %4536 = vtanh.f32 %v4015_v42  ;;  %2326 = vmatprep.subr.bf16.mxu0 %v4369_v23 }
 0x375   : > { %v4527_v46 = vpop.eup %4526  ;;  %3837 = vmatpush3.bf16.msra.mxu1 %v4375_v28 }
 0x376   : > { %v4529_v45 = vpop.eup %4528  ;;  %v1882_v55 = vpop.f32.mrb[24].mxu1  ;;  %v1973_v0 = vpack.c.bf16 %v4527_v46, %v4523_v43  ;;  %3838 = vmatprep.subr.bf16.mxu1 %v4376_v29  ;;  %v4382_v29 = vld [vmem:[%s5788_s4 + $0x170] sm:$0xff]  }
 0x377   : > { %v4016_v7 = vadd.f32 %v1882_v55, %v5384_v17  ;;  %v1884_v8 = vpop.f32.mrb[25].mxu1  ;;  %v1974_v9 = vpack.c.bf16 %v4529_v45, %v4525_v44 }
 0x378   : > { %v4017_v10 = vadd.f32 %v1884_v8, %v5387_v18  ;;  %v1886_v48 = vpop.f32.mrb[26].mxu1 }
 0x379   : > { %4538 = vtanh.f32 %v4016_v7  ;;  %v4018_v50 = vadd.f32 %v1886_v48, %v5384_v17  ;;  %v1888_v53 = vpop.f32.mrb[27].mxu1  ;;  %2174 = vmatprep.mubr.bf16.mxu0 %v1974_v9  ;;  %3839 = vmatpush3.bf16.msra.mxu1 %v4377_v30  ;;  %v4383_v30 = vld [vmem:[%s5788_s4 + $0x130] sm:$0xff]  }
 0x37a   : > { %4540 = vtanh.f32 %v4017_v10  ;;  %v4019_v54 = vadd.f32 %v1888_v53, %v5387_v18  ;;  %2175 = vmatmul.mubr.bf16.gmra.mrb[80].mxu0 %v1973_v0  ;;  %3840 = vmatprep.subr.bf16.mxu1 %v4378_v31  ;;  %v4384_v31 = vld [vmem:[%s5788_s4 + $0x178] sm:$0xff]  }
 0x37b   : > { %v4531_v56 = vpop.eup %4530  ;;  %4542 = vtanh.f32 %v4018_v50 }
 0x37c   : > { %v4533_v57 = vpop.eup %4532  ;;  %4544 = vtanh.f32 %v4019_v54 }
 0x37d   : > { %v4535_v51 = vpop.eup %4534  ;;  %3841 = vmatpush3.bf16.msra.mxu1 %v4379_v32  ;;  %v4385_v32 = vld [vmem:[%s5788_s4 + $0x138] sm:$0xff]  }
 0x37e   : > { %v4537_v58 = vpop.eup %4536  ;;  %v1892_v59 = vpop.f32.mrb[28].mxu1  ;;  %v1975_v52 = vpack.c.bf16 %v4535_v51, %v4531_v56  ;;  %3842 = vmatprep.subr.bf16.mxu1 %v4380_v33  ;;  %v4388_v33 = vld [vmem:[%s5786_s2 + $0x184] ss:$8 sps:$4 sm:$0xff]  }
 0x37f   : > { %v4020_v60 = vadd.f32 %v1892_v59, %v5384_v17  ;;  %v1894_v61 = vpop.f32.mrb[29].mxu1  ;;  %v1976_v62 = vpack.c.bf16 %v4537_v58, %v4533_v57 }
 0x380   : > { %v4021_v63 = vadd.f32 %v1894_v61, %v5387_v18  ;;  %v1896_v1 = vpop.f32.mrb[30].mxu1 }
 0x381   : > { %4546 = vtanh.f32 %v4020_v60  ;;  %v4022_v2 = vadd.f32 %v1896_v1, %v5384_v17  ;;  %v1898_v3 = vpop.f32.mrb[31].mxu1  ;;  %2182 = vmatprep.mubr.bf16.mxu0 %v1976_v62  ;;  %3843 = vmatpush3.bf16.msra.mxu1 %v4381_v34  ;;  %v327_v34 = vsub.s32 4, %v5230_v47 }
 0x382   : > { %4548 = vtanh.f32 %v4021_v63  ;;  %v4023_v4 = vadd.f32 %v1898_v3, %v5387_v18  ;;  %2183 = vmatmul.mubr.bf16.gmra.mrb[84].mxu0 %v1975_v52  ;;  %v4367_v18 = vld [vmem:[%s5786_s2 + $0x170] ss:$8 sps:$4 sm:$0xff]   ;;  %3844 = vmatprep.subr.bf16.mxu1 %v4382_v29 }
 0x383   : > { %v4539_v5 = vpop.eup %4538  ;;  %4550 = vtanh.f32 %v4022_v2  ;;  %2327 = vmatpush1.bf16.msra.mxu0 %v4367_v18 }
 0x384   : > { %v4541_v11 = vpop.eup %4540  ;;  %4552 = vtanh.f32 %v4023_v4 }
 0x385   : > { %v4543_v12 = vpop.eup %4542  ;;  %3845 = vmatpush3.bf16.msra.mxu1 %v4383_v30  ;;  %v4400_v30 = vld [vmem:[%s5786_s2 + $0x1c4] ss:$8 sps:$4 sm:$0xff]  }
 0x386   : > { %v4545_v13 = vpop.eup %4544  ;;  %v1977_v14 = vpack.c.bf16 %v4543_v12, %v4539_v5  ;;  %3846 = vmatprep.subr.bf16.mxu1 %v4384_v31 }
 0x387   : > { %v1978_v15 = vpack.c.bf16 %v4545_v13, %v4541_v11 }
 0x389   : > { %2190 = vmatprep.mubr.bf16.mxu0 %v1978_v15  ;;  %3847 = vmatpush3.bf16.msra.mxu1 %v4385_v32 }
 0x38a   : > { %2191 = vmatmul.mubr.bf16.gmra.mrb[88].mxu0 %v1977_v14  ;;  %2836 = vmatprep.subr.bf16.mxu1 %v4388_v33 }
 0x38b   : > { %v4547_v16 = vpop.eup %4546 }
 0x38c   : > { %v4549_v19 = vpop.eup %4548 }
 0x38d   : > { %v4551_v20 = vpop.eup %4550 }
 0x38e   : > { %v4553_v17 = vpop.eup %4552  ;;  %v1979_v21 = vpack.c.bf16 %v4551_v20, %v4547_v16 }
 0x38f   : > { %v1980_v22 = vpack.c.bf16 %v4553_v17, %v4549_v19 }
 0x391   : > { %2198 = vmatprep.mubr.bf16.mxu0 %v1980_v22 }
 0x392   : > { %2199 = vmatmul.mubr.bf16.gmra.mrb[92].mxu0 %v1979_v21 }
 0x393   : > { %2344 = vmatprep.mubr.bf16.mxu0 %v4747_v6 }
 0x42d   : > { %v3784_v35 = vpop.f32.mrb[64].mxu0 }
 0x42e   : > { %v3785_v36 = vpop.f32.mrb[65].mxu0 }
 0x42f   : > { %v3786_v38 = vadd.f32 %v3785_v36, %v3784_v35  ;;  %v3787_v39 = vpop.f32.mrb[66].mxu0  ;;  %v331_v35 = vsub.s32 5, %v5230_v47  ;;  %v5530_v36 = vld [vmem:[%s5787_s3] sm:$0xff] }
 0x430   : > { %v3788_v40 = vpop.f32.mrb[67].mxu0 }
 0x431   : > { %v3789_v41 = vadd.f32 %v3788_v40, %v3787_v39  ;;  %v5536_v39 = vrot.slane %v5530_v36, %v331_v35 }
 0x433   : > { %v2207_v37 = vpack.c.bf16 %v3789_v41, %v3786_v38  ;;  %v5533_v38 = vrot.slane %v5530_v36, %v327_v34 }
 0x435   : > { %v3790_v42 = vpop.f32.mrb[68].mxu0  ;;  %2345 = vmatmul.mubr.bf16.vlgmr.msra.gmra.mrb[32].mxu0 %v2207_v37 }
 0x436   : > { %v3791_v43 = vpop.f32.mrb[69].mxu0  ;;  %2354 = vmatprep.mubr.bf16.mxu0 %v4747_v6 }
 0x437   : > { %v3792_v44 = vadd.f32 %v3791_v43, %v3790_v42  ;;  %v3793_v46 = vpop.f32.mrb[70].mxu0 }
 0x438   : > { %v3794_v45 = vpop.f32.mrb[71].mxu0 }
 0x439   : > { %v3795_v55 = vadd.f32 %v3794_v45, %v3793_v46 }
 0x43b   : > { %v2208_v0 = vpack.c.bf16 %v3795_v55, %v3792_v44 }
 0x43d   : > { %v3796_v7 = vpop.f32.mrb[72].mxu0  ;;  %2355 = vmatmul.mubr.bf16.gmra.mrb[36].mxu0 %v2208_v0 }
 0x43e   : > { %v3797_v8 = vpop.f32.mrb[73].mxu0  ;;  %2364 = vmatprep.mubr.bf16.mxu0 %v4747_v6 }
 0x43f   : > { %v3798_v9 = vadd.f32 %v3797_v8, %v3796_v7  ;;  %v3799_v10 = vpop.f32.mrb[74].mxu0 }
 0x440   : > { %v3800_v48 = vpop.f32.mrb[75].mxu0 }
 0x441   : > { %v3801_v50 = vadd.f32 %v3800_v48, %v3799_v10 }
 0x443   : > { %v2209_v53 = vpack.c.bf16 %v3801_v50, %v3798_v9 }
 0x445   : > { %v3802_v54 = vpop.f32.mrb[76].mxu0  ;;  %2365 = vmatmul.mubr.bf16.gmra.mrb[40].mxu0 %v2209_v53 }
 0x446   : > { %v3803_v56 = vpop.f32.mrb[77].mxu0  ;;  %2374 = vmatprep.mubr.bf16.mxu0 %v4747_v6 }
 0x447   : > { %v3804_v57 = vadd.f32 %v3803_v56, %v3802_v54  ;;  %v3805_v51 = vpop.f32.mrb[78].mxu0 }
 0x448   : > { %v3806_v58 = vpop.f32.mrb[79].mxu0 }
 0x449   : > { %v3807_v59 = vadd.f32 %v3806_v58, %v3805_v51 }
 0x44b   : > { %v2210_v52 = vpack.c.bf16 %v3807_v59, %v3804_v57 }
 0x44d   : > { %v3808_v60 = vpop.f32.mrb[80].mxu0  ;;  %2375 = vmatmul.mubr.bf16.gmra.mrb[44].mxu0 %v2210_v52 }
 0x44e   : > { %v3809_v61 = vpop.f32.mrb[81].mxu0  ;;  %2384 = vmatprep.mubr.bf16.mxu0 %v4747_v6 }
 0x44f   : > { %v3810_v62 = vadd.f32 %v3809_v61, %v3808_v60  ;;  %v3811_v63 = vpop.f32.mrb[82].mxu0  ;;  %v4386_v61 = vld [vmem:[%s5786_s2 + $0x180] ss:$8 sps:$4 sm:$0xff]  }
 0x450   : > { %v3812_v1 = vpop.f32.mrb[83].mxu0 }
 0x451   : > { %v3813_v2 = vadd.f32 %v3812_v1, %v3811_v63  ;;  %v4391_v1 = vld [vmem:[%s5786_s2 + $0x194] ss:$8 sps:$4 sm:$0xff]  }
 0x453   : > { %v2211_v3 = vpack.c.bf16 %v3813_v2, %v3810_v62 }
 0x455   : > { %v3814_v4 = vpop.f32.mrb[84].mxu0  ;;  %2385 = vmatmul.mubr.bf16.gmra.mrb[48].mxu0 %v2211_v3 }
 0x456   : > { %v3815_v5 = vpop.f32.mrb[85].mxu0  ;;  %2394 = vmatprep.mubr.bf16.mxu0 %v4747_v6 }
 0x457   : > { %v3816_v11 = vadd.f32 %v3815_v5, %v3814_v4  ;;  %v3817_v12 = vpop.f32.mrb[86].mxu0 }
 0x458   : > { %v3818_v13 = vpop.f32.mrb[87].mxu0 }
 0x459   : > { %v3819_v14 = vadd.f32 %v3818_v13, %v3817_v12  ;;  %v4394_v13 = vld [vmem:[%s5786_s2 + $0x1a4] ss:$8 sps:$4 sm:$0xff]  }
 0x45b   : > { %v2212_v15 = vpack.c.bf16 %v3819_v14, %v3816_v11  ;;  %v4389_v11 = vld [vmem:[%s5786_s2 + $0x190] ss:$8 sps:$4 sm:$0xff]  }
 0x45d   : > { %v3820_v16 = vpop.f32.mrb[88].mxu0  ;;  %2395 = vmatmul.mubr.bf16.gmra.mrb[52].mxu0 %v2212_v15 }
 0x45e   : > { %v3821_v19 = vpop.f32.mrb[89].mxu0  ;;  %2404 = vmatprep.mubr.bf16.mxu0 %v4747_v6 }
 0x45f   : > { %v3822_v20 = vadd.f32 %v3821_v19, %v3820_v16  ;;  %v3823_v17 = vpop.f32.mrb[90].mxu0 }
 0x460   : > { %v3824_v21 = vpop.f32.mrb[91].mxu0 }
 0x461   : > { %v3825_v22 = vadd.f32 %v3824_v21, %v3823_v17 }
 0x463   : > { %v2213_v18 = vpack.c.bf16 %v3825_v22, %v3822_v20  ;;  %v4392_v22 = vld [vmem:[%s5786_s2 + $0x1a0] ss:$8 sps:$4 sm:$0xff]  }
 0x465   : > { %v3826_v23 = vpop.f32.mrb[92].mxu0  ;;  %2405 = vmatmul.mubr.bf16.gmra.mrb[56].mxu0 %v2213_v18 }
 0x466   : > { %v3827_v24 = vpop.f32.mrb[93].mxu0  ;;  %2414 = vmatprep.mubr.bf16.mxu0 %v4747_v6 }
 0x467   : > { %v3828_v25 = vadd.f32 %v3827_v24, %v3826_v23  ;;  %v3829_v26 = vpop.f32.mrb[94].mxu0  ;;  %v4397_v24 = vld [vmem:[%s5786_s2 + $0x1b4] ss:$8 sps:$4 sm:$0xff]  }
 0x468   : > { %v3830_v27 = vpop.f32.mrb[95].mxu0 }
 0x469   : > { %v3831_v49 = vadd.f32 %v3830_v27, %v3829_v26 }
 0x46b   : > { %v2214_v28 = vpack.c.bf16 %v3831_v49, %v3828_v25 }
 0x46d   : > { %2415 = vmatmul.mubr.bf16.gmra.mrb[60].mxu0 %v2214_v28  ;;  %v4395_v28 = vld [vmem:[%s5786_s2 + $0x1b0] ss:$8 sps:$4 sm:$0xff]  }
 0x508   : > { %v2346_v40 = vpop.f32.mrb[32].mxu0 }
 0x509   : > { %v4024_v41 = vadd.f32 %v2346_v40, %v5533_v38  ;;  %v2348_v37 = vpop.f32.mrb[33].mxu0 }
 0x50a   : > { %v4025_v42 = vadd.f32 %v2348_v37, %v5536_v39  ;;  %v2350_v43 = vpop.f32.mrb[34].mxu0  ;;  %v4398_v37 = vld [vmem:[%s5786_s2 + $0x1c0] ss:$8 sps:$4 sm:$0xff]  }
 0x50b   : > { %4554 = vtanh.f32 %v4024_v41  ;;  %v4026_v44 = vadd.f32 %v2350_v43, %v5533_v38  ;;  %v2352_v46 = vpop.f32.mrb[35].mxu0 }
 0x50c   : > { %4556 = vtanh.f32 %v4025_v42  ;;  %v4027_v45 = vadd.f32 %v2352_v46, %v5536_v39 }
 0x50d   : > { %4558 = vtanh.f32 %v4026_v44  ;;  %v4403_v44 = vld [vmem:[%s5786_s2 + $0x1d4] ss:$8 sps:$4 sm:$0xff]  }
 0x50e   : > { %4560 = vtanh.f32 %v4027_v45 }
 0x510   : > { %v2356_v55 = vpop.f32.mrb[36].mxu0 }
 0x511   : > { %v4028_v0 = vadd.f32 %v2356_v55, %v5533_v38  ;;  %v2358_v7 = vpop.f32.mrb[37].mxu0 }
 0x512   : > { %v4029_v8 = vadd.f32 %v2358_v7, %v5536_v39  ;;  %v2360_v9 = vpop.f32.mrb[38].mxu0  ;;  %v4401_v7 = vld [vmem:[%s5786_s2 + $0x1d0] ss:$8 sps:$4 sm:$0xff]  }
 0x513   : > { %4562 = vtanh.f32 %v4028_v0  ;;  %v4030_v10 = vadd.f32 %v2360_v9, %v5533_v38  ;;  %v2362_v48 = vpop.f32.mrb[39].mxu0  ;;  %v4406_v9 = vld [vmem:[%s5786_s2 + $0x1e4] ss:$8 sps:$4 sm:$0xff]  }
 0x514   : > { %4564 = vtanh.f32 %v4029_v8  ;;  %v4031_v50 = vadd.f32 %v2362_v48, %v5536_v39 }
 0x515   : > { %v4555_v53 = vpop.eup %4554  ;;  %4566 = vtanh.f32 %v4030_v10 }
 0x516   : > { %v4557_v54 = vpop.eup %4556  ;;  %4568 = vtanh.f32 %v4031_v50 }
 0x517   : > { %v4559_v56 = vpop.eup %4558 }
 0x518   : > { %v4561_v57 = vpop.eup %4560  ;;  %v2366_v51 = vpop.f32.mrb[40].mxu0  ;;  %v2489_v58 = vpack.c.bf16 %v4559_v56, %v4555_v53 }
 0x519   : > { %v4032_v59 = vadd.f32 %v2366_v51, %v5533_v38  ;;  %v2368_v52 = vpop.f32.mrb[41].mxu0  ;;  %v2490_v60 = vpack.c.bf16 %v4561_v57, %v4557_v54  ;;  %v4404_v51 = vld [vmem:[%s5786_s2 + $0x1e0] ss:$8 sps:$4 sm:$0xff]  }
 0x51a   : > { %v4033_v62 = vadd.f32 %v2368_v52, %v5536_v39  ;;  %v2370_v63 = vpop.f32.mrb[42].mxu0 }
 0x51b   : > { %4570 = vtanh.f32 %v4032_v59  ;;  %v4034_v2 = vadd.f32 %v2370_v63, %v5533_v38  ;;  %v2372_v3 = vpop.f32.mrb[43].mxu0  ;;  %2666 = vmatprep.mubr.bf16.mxu1 %v2490_v60 }
 0x51c   : > { %4572 = vtanh.f32 %v4033_v62  ;;  %v4035_v4 = vadd.f32 %v2372_v3, %v5536_v39  ;;  %2667 = vmatmul.mubr.bf16.vlgmr.msra.gmra.mrb[96].mxu1 %v2489_v58 }
 0x51d   : > { %v4563_v5 = vpop.eup %4562  ;;  %4574 = vtanh.f32 %v4034_v2  ;;  %2837 = vmatpush1.bf16.msra.mxu1 %v4386_v61 }
 0x51e   : > { %v4565_v12 = vpop.eup %4564  ;;  %4576 = vtanh.f32 %v4035_v4  ;;  %2838 = vmatprep.subr.bf16.mxu1 %v4391_v1 }
 0x51f   : > { %v4567_v14 = vpop.eup %4566 }
 0x520   : > { %v4569_v15 = vpop.eup %4568  ;;  %v2376_v16 = vpop.f32.mrb[44].mxu0  ;;  %v2491_v19 = vpack.c.bf16 %v4567_v14, %v4563_v5 }
 0x521   : > { %v4036_v20 = vadd.f32 %v2376_v16, %v5533_v38  ;;  %v2378_v17 = vpop.f32.mrb[45].mxu0  ;;  %v2492_v21 = vpack.c.bf16 %v4569_v15, %v4565_v12  ;;  %2839 = vmatpush1.bf16.msra.mxu1 %v4389_v11 }
 0x522   : > { %v4037_v18 = vadd.f32 %v2378_v17, %v5536_v39  ;;  %v2380_v23 = vpop.f32.mrb[46].mxu0  ;;  %2840 = vmatprep.subr.bf16.mxu1 %v4394_v13 }
 0x523   : > { %4578 = vtanh.f32 %v4036_v20  ;;  %v4038_v25 = vadd.f32 %v2380_v23, %v5533_v38  ;;  %v2382_v26 = vpop.f32.mrb[47].mxu0  ;;  %2674 = vmatprep.mubr.bf16.mxu1 %v2492_v21 }
 0x524   : > { %4580 = vtanh.f32 %v4037_v18  ;;  %v4039_v27 = vadd.f32 %v2382_v26, %v5536_v39  ;;  %2675 = vmatmul.mubr.bf16.gmra.mrb[100].mxu1 %v2491_v19 }
 0x525   : > { %v4571_v49 = vpop.eup %4570  ;;  %4582 = vtanh.f32 %v4038_v25  ;;  %2841 = vmatpush1.bf16.msra.mxu1 %v4392_v22 }
 0x526   : > { %v4573_v29 = vpop.eup %4572  ;;  %4584 = vtanh.f32 %v4039_v27  ;;  %2842 = vmatprep.subr.bf16.mxu1 %v4397_v24 }
 0x527   : > { %v4575_v31 = vpop.eup %4574 }
 0x528   : > { %v4577_v32 = vpop.eup %4576  ;;  %v2386_v33 = vpop.f32.mrb[48].mxu0  ;;  %v2493_v34 = vpack.c.bf16 %v4575_v31, %v4571_v49 }
 0x529   : > { %v4040_v35 = vadd.f32 %v2386_v33, %v5533_v38  ;;  %v2388_v40 = vpop.f32.mrb[49].mxu0  ;;  %v2494_v41 = vpack.c.bf16 %v4577_v32, %v4573_v29  ;;  %2843 = vmatpush1.bf16.msra.mxu1 %v4395_v28 }
 0x52a   : > { %v4041_v42 = vadd.f32 %v2388_v40, %v5536_v39  ;;  %v2390_v43 = vpop.f32.mrb[50].mxu0  ;;  %2844 = vmatprep.subr.bf16.mxu1 %v4400_v30 }
 0x52b   : > { %4586 = vtanh.f32 %v4040_v35  ;;  %v4042_v46 = vadd.f32 %v2390_v43, %v5533_v38  ;;  %v2392_v45 = vpop.f32.mrb[51].mxu0  ;;  %2682 = vmatprep.mubr.bf16.mxu1 %v2494_v41 }
 0x52c   : > { %4588 = vtanh.f32 %v4041_v42  ;;  %v4043_v55 = vadd.f32 %v2392_v45, %v5536_v39  ;;  %2683 = vmatmul.mubr.bf16.gmra.mrb[104].mxu1 %v2493_v34  ;;  %v4410_v45 = vld [vmem:[%s5788_s4 + $0x1c0] sm:$0xff]  }
 0x52d   : > { %v4579_v0 = vpop.eup %4578  ;;  %4590 = vtanh.f32 %v4042_v46  ;;  %2845 = vmatpush1.bf16.msra.mxu1 %v4398_v37  ;;  %v4409_v46 = vld [vmem:[%s5786_s2 + $0x1f4] ss:$8 sps:$4 sm:$0xff]   ;;  %3896 = vmatprep.subr.bf16.mxu0 %v4410_v45 }
 0x52e   : > { %v4581_v8 = vpop.eup %4580  ;;  %4592 = vtanh.f32 %v4043_v55  ;;  %2846 = vmatprep.subr.bf16.mxu1 %v4403_v44  ;;  %v4411_v55 = vld [vmem:[%s5788_s4 + $0x180] sm:$0xff]  }
 0x52f   : > { %v4583_v10 = vpop.eup %4582  ;;  %3897 = vmatpush3.bf16.msra.mxu0 %v4411_v55 }
 0x530   : > { %v4585_v48 = vpop.eup %4584  ;;  %v2396_v50 = vpop.f32.mrb[52].mxu0  ;;  %v2495_v53 = vpack.c.bf16 %v4583_v10, %v4579_v0  ;;  %v4412_v0 = vld [vmem:[%s5788_s4 + $0x1c8] sm:$0xff]   ;;  %v4416_v10 = vld [vmem:[%s5788_s4 + $0x1d8] sm:$0xff]  }
 0x531   : > { %v4044_v54 = vadd.f32 %v2396_v50, %v5533_v38  ;;  %v2398_v56 = vpop.f32.mrb[53].mxu0  ;;  %v2496_v57 = vpack.c.bf16 %v4585_v48, %v4581_v8  ;;  %2847 = vmatpush1.bf16.msra.mxu1 %v4401_v7  ;;  %v4413_v7 = vld [vmem:[%s5788_s4 + $0x188] sm:$0xff]   ;;  %3898 = vmatprep.subr.bf16.mxu0 %v4412_v0  ;;  %v4414_v8 = vld [vmem:[%s5788_s4 + $0x1d0] sm:$0xff]   ;;  %v4417_v48 = vld [vmem:[%s5788_s4 + $0x198] sm:$0xff]  }
 0x532   : > { %v4045_v58 = vadd.f32 %v2398_v56, %v5536_v39  ;;  %v2400_v59 = vpop.f32.mrb[54].mxu0  ;;  %2848 = vmatprep.subr.bf16.mxu1 %v4406_v9  ;;  %v4415_v9 = vld [vmem:[%s5788_s4 + $0x190] sm:$0xff]   ;;  %v4418_v50 = vld [vmem:[%s5788_s4 + $0x1e0] sm:$0xff]   ;;  %v4421_v56 = vld [vmem:[%s5788_s4 + $0x1a8] sm:$0xff]  }
 0x533   : > { %4594 = vtanh.f32 %v4044_v54  ;;  %v4046_v52 = vadd.f32 %v2400_v59, %v5533_v38  ;;  %v2402_v60 = vpop.f32.mrb[55].mxu0  ;;  %2690 = vmatprep.mubr.bf16.mxu1 %v2496_v57  ;;  %3899 = vmatpush3.bf16.msra.mxu0 %v4413_v7  ;;  %v4420_v54 = vld [vmem:[%s5788_s4 + $0x1e8] sm:$0xff]  }
 0x534   : > { %4596 = vtanh.f32 %v4045_v58  ;;  %v4047_v61 = vadd.f32 %v2402_v60, %v5536_v39  ;;  %2691 = vmatmul.mubr.bf16.gmra.mrb[108].mxu1 %v2495_v53  ;;  %3900 = vmatprep.subr.bf16.mxu0 %v4414_v8  ;;  %v4419_v53 = vld [vmem:[%s5788_s4 + $0x1a0] sm:$0xff]  }
 0x535   : > { %v4587_v62 = vpop.eup %4586  ;;  %4598 = vtanh.f32 %v4046_v52  ;;  %2849 = vmatpush1.bf16.msra.mxu1 %v4404_v51 }
 0x536   : > { %v4589_v63 = vpop.eup %4588  ;;  %4600 = vtanh.f32 %v4047_v61  ;;  %2850 = vmatprep.subr.bf16.mxu1 %v4409_v46 }
 0x537   : > { %v4591_v1 = vpop.eup %4590  ;;  %3901 = vmatpush3.bf16.msra.mxu0 %v4415_v9 }
 0x538   : > { %v4593_v2 = vpop.eup %4592  ;;  %v2406_v3 = vpop.f32.mrb[56].mxu0  ;;  %v2497_v4 = vpack.c.bf16 %v4591_v1, %v4587_v62  ;;  %3902 = vmatprep.subr.bf16.mxu0 %v4416_v10 }
 0x539   : > { %v4048_v5 = vadd.f32 %v2406_v3, %v5533_v38  ;;  %v2408_v11 = vpop.f32.mrb[57].mxu0  ;;  %v2498_v12 = vpack.c.bf16 %v4593_v2, %v4589_v63 }
 0x53a   : > { %v4049_v13 = vadd.f32 %v2408_v11, %v5536_v39  ;;  %v2410_v14 = vpop.f32.mrb[58].mxu0 }
 0x53b   : > { %4602 = vtanh.f32 %v4048_v5  ;;  %v4050_v15 = vadd.f32 %v2410_v14, %v5533_v38  ;;  %v2412_v16 = vpop.f32.mrb[59].mxu0  ;;  %2698 = vmatprep.mubr.bf16.mxu1 %v2498_v12  ;;  %3903 = vmatpush3.bf16.msra.mxu0 %v4417_v48  ;;  %v4422_v48 = vld [vmem:[%s5788_s4 + $0x1f0] sm:$0xff]  }
 0x53c   : > { %4604 = vtanh.f32 %v4049_v13  ;;  %v4051_v19 = vadd.f32 %v2412_v16, %v5536_v39  ;;  %2699 = vmatmul.mubr.bf16.gmra.mrb[112].mxu1 %v2497_v4  ;;  %3904 = vmatprep.subr.bf16.mxu0 %v4418_v50  ;;  %v4423_v50 = vld [vmem:[%s5788_s4 + $0x1b0] sm:$0xff]  }
 0x53d   : > { %v4595_v20 = vpop.eup %4594  ;;  %4606 = vtanh.f32 %v4050_v15 }
 0x53e   : > { %v4597_v17 = vpop.eup %4596  ;;  %4608 = vtanh.f32 %v4051_v19 }
 0x53f   : > { %v4599_v21 = vpop.eup %4598  ;;  %3905 = vmatpush3.bf16.msra.mxu0 %v4419_v53  ;;  %v4425_v53 = vld [vmem:[%s5788_s4 + $0x1b8] sm:$0xff]  }
 0x540   : > { %v4601_v22 = vpop.eup %4600  ;;  %v2416_v18 = vpop.f32.mrb[60].mxu0  ;;  %v2499_v23 = vpack.c.bf16 %v4599_v21, %v4595_v20  ;;  %3906 = vmatprep.subr.bf16.mxu0 %v4420_v54  ;;  %v335_v54 = vsub.s32 6, %v5230_v47 }
 0x541   : > { %v4052_v24 = vadd.f32 %v2416_v18, %v5533_v38  ;;  %v2418_v25 = vpop.f32.mrb[61].mxu0  ;;  %v2500_v26 = vpack.c.bf16 %v4601_v22, %v4597_v17 }
 0x542   : > { %v4053_v27 = vadd.f32 %v2418_v25, %v5536_v39  ;;  %v2420_v49 = vpop.f32.mrb[62].mxu0 }
 0x543   : > { %4610 = vtanh.f32 %v4052_v24  ;;  %v4054_v28 = vadd.f32 %v2420_v49, %v5533_v38  ;;  %v2422_v29 = vpop.f32.mrb[63].mxu0  ;;  %2706 = vmatprep.mubr.bf16.mxu1 %v2500_v26  ;;  %3907 = vmatpush3.bf16.msra.mxu0 %v4421_v56  ;;  %v339_v56 = vsub.s32 7, %v5230_v47 }
 0x544   : > { %4612 = vtanh.f32 %v4053_v27  ;;  %v4055_v30 = vadd.f32 %v2422_v29, %v5536_v39  ;;  %2707 = vmatmul.mubr.bf16.gmra.mrb[116].mxu1 %v2499_v23  ;;  %v4407_v39 = vld [vmem:[%s5786_s2 + $0x1f0] ss:$8 sps:$4 sm:$0xff]   ;;  %3908 = vmatprep.subr.bf16.mxu0 %v4422_v48 }
 0x545   : > { %v4603_v31 = vpop.eup %4602  ;;  %4614 = vtanh.f32 %v4054_v28  ;;  %2851 = vmatpush1.bf16.msra.mxu1 %v4407_v39 }
 0x546   : > { %v4605_v32 = vpop.eup %4604  ;;  %4616 = vtanh.f32 %v4055_v30 }
 0x547   : > { %v4607_v33 = vpop.eup %4606  ;;  %3909 = vmatpush3.bf16.msra.mxu0 %v4423_v50 }
 0x548   : > { %v4609_v34 = vpop.eup %4608  ;;  %v2501_v35 = vpack.c.bf16 %v4607_v33, %v4603_v31 }
 0x549   : > { %v2502_v40 = vpack.c.bf16 %v4609_v34, %v4605_v32 }
 0x54b   : > { %2714 = vmatprep.mubr.bf16.mxu1 %v2502_v40 }
 0x54c   : > { %2715 = vmatmul.mubr.bf16.gmra.mrb[120].mxu1 %v2501_v35 }
 0x54d   : > { %v4611_v41 = vpop.eup %4610 }
 0x54e   : > { %v4613_v37 = vpop.eup %4612 }
 0x54f   : > { %v4615_v42 = vpop.eup %4614 }
 0x550   : > { %v4617_v38 = vpop.eup %4616  ;;  %v2503_v43 = vpack.c.bf16 %v4615_v42, %v4611_v41 }
 0x551   : > { %v2504_v44 = vpack.c.bf16 %v4617_v38, %v4613_v37 }
 0x553   : > { %2722 = vmatprep.mubr.bf16.mxu1 %v2504_v44 }
 0x554   : > { %2723 = vmatmul.mubr.bf16.gmra.mrb[124].mxu1 %v2503_v43 }
 0x555   : > { %2868 = vmatprep.mubr.bf16.mxu1 %v4747_v6 }
 0x5ef   : > { %v3848_v57 = vpop.f32.mrb[96].mxu1 }
 0x5f0   : > { %v3849_v51 = vpop.f32.mrb[97].mxu1 }
 0x5f1   : > { %v3850_v58 = vadd.f32 %v3849_v51, %v3848_v57  ;;  %v3851_v59 = vpop.f32.mrb[98].mxu1  ;;  %v5674_v57 = vrot.slane %v5530_v36, %v335_v54  ;;  %v5677_v51 = vrot.slane %v5530_v36, %v339_v56 }
 0x5f2   : > { %v3852_v52 = vpop.f32.mrb[99].mxu1 }
 0x5f3   : > { %v3853_v60 = vadd.f32 %v3852_v52, %v3851_v59 }
 0x5f5   : > { %v2731_v61 = vpack.c.bf16 %v3853_v60, %v3850_v58 }
 0x5f7   : > { %v3854_v62 = vpop.f32.mrb[100].mxu1  ;;  %2869 = vmatmul.mubr.bf16.vlgmr.msra.gmra.mrb[32].mxu1 %v2731_v61 }
 0x5f8   : > { %v3855_v63 = vpop.f32.mrb[101].mxu1  ;;  %2878 = vmatprep.mubr.bf16.mxu1 %v4747_v6 }
 0x5f9   : > { %v3856_v1 = vadd.f32 %v3855_v63, %v3854_v62  ;;  %v3857_v2 = vpop.f32.mrb[102].mxu1 }
 0x5fa   : > { %v3858_v3 = vpop.f32.mrb[103].mxu1 }
 0x5fb   : > { %v3859_v4 = vadd.f32 %v3858_v3, %v3857_v2 }
 0x5fd   : > { %v2732_v5 = vpack.c.bf16 %v3859_v4, %v3856_v1 }
 0x5ff   : > { %v3860_v11 = vpop.f32.mrb[104].mxu1  ;;  %2879 = vmatmul.mubr.bf16.gmra.mrb[36].mxu1 %v2732_v5 }
 0x600   : > { %v3861_v12 = vpop.f32.mrb[105].mxu1  ;;  %2888 = vmatprep.mubr.bf16.mxu1 %v4747_v6 }
 0x601   : > { %v3862_v13 = vadd.f32 %v3861_v12, %v3860_v11  ;;  %v3863_v14 = vpop.f32.mrb[106].mxu1 }
 0x602   : > { %v3864_v15 = vpop.f32.mrb[107].mxu1 }
 0x603   : > { %v3865_v16 = vadd.f32 %v3864_v15, %v3863_v14 }
 0x605   : > { %v2733_v19 = vpack.c.bf16 %v3865_v16, %v3862_v13 }
 0x607   : > { %v3866_v20 = vpop.f32.mrb[108].mxu1  ;;  %2889 = vmatmul.mubr.bf16.gmra.mrb[40].mxu1 %v2733_v19 }
 0x608   : > { %v3867_v17 = vpop.f32.mrb[109].mxu1  ;;  %2898 = vmatprep.mubr.bf16.mxu1 %v4747_v6 }
 0x609   : > { %v3868_v21 = vadd.f32 %v3867_v17, %v3866_v20  ;;  %v3869_v22 = vpop.f32.mrb[110].mxu1 }
 0x60a   : > { %v3870_v18 = vpop.f32.mrb[111].mxu1 }
 0x60b   : > { %v3871_v23 = vadd.f32 %v3870_v18, %v3869_v22 }
 0x60d   : > { %v2734_v24 = vpack.c.bf16 %v3871_v23, %v3868_v21 }
 0x60f   : > { %v3872_v25 = vpop.f32.mrb[112].mxu1  ;;  %2899 = vmatmul.mubr.bf16.gmra.mrb[44].mxu1 %v2734_v24 }
 0x610   : > { %v3873_v26 = vpop.f32.mrb[113].mxu1  ;;  %2908 = vmatprep.mubr.bf16.mxu1 %v4747_v6 }
 0x611   : > { %v3874_v27 = vadd.f32 %v3873_v26, %v3872_v25  ;;  %v3875_v49 = vpop.f32.mrb[114].mxu1 }
 0x612   : > { %v3876_v28 = vpop.f32.mrb[115].mxu1 }
 0x613   : > { %v3877_v29 = vadd.f32 %v3876_v28, %v3875_v49 }
 0x615   : > { %v2735_v30 = vpack.c.bf16 %v3877_v29, %v3874_v27 }
 0x617   : > { %v3878_v31 = vpop.f32.mrb[116].mxu1  ;;  %2909 = vmatmul.mubr.bf16.gmra.mrb[48].mxu1 %v2735_v30 }
 0x618   : > { %v3879_v32 = vpop.f32.mrb[117].mxu1  ;;  %2918 = vmatprep.mubr.bf16.mxu1 %v4747_v6 }
 0x619   : > { %v3880_v33 = vadd.f32 %v3879_v32, %v3878_v31  ;;  %v3881_v34 = vpop.f32.mrb[118].mxu1 }
 0x61a   : > { %v3882_v35 = vpop.f32.mrb[119].mxu1 }
 0x61b   : > { %v3883_v40 = vadd.f32 %v3882_v35, %v3881_v34 }
 0x61d   : > { %v2736_v41 = vpack.c.bf16 %v3883_v40, %v3880_v33 }
 0x61f   : > { %v3884_v37 = vpop.f32.mrb[120].mxu1  ;;  %2919 = vmatmul.mubr.bf16.gmra.mrb[52].mxu1 %v2736_v41 }
 0x620   : > { %v3885_v42 = vpop.f32.mrb[121].mxu1  ;;  %2928 = vmatprep.mubr.bf16.mxu1 %v4747_v6 }
 0x621   : > { %v3886_v38 = vadd.f32 %v3885_v42, %v3884_v37  ;;  %v3887_v43 = vpop.f32.mrb[122].mxu1 }
 0x622   : > { %v3888_v44 = vpop.f32.mrb[123].mxu1 }
 0x623   : > { %v3889_v39 = vadd.f32 %v3888_v44, %v3887_v43 }
 0x625   : > { %v2737_v46 = vpack.c.bf16 %v3889_v39, %v3886_v38 }
 0x627   : > { %v3890_v45 = vpop.f32.mrb[124].mxu1  ;;  %2929 = vmatmul.mubr.bf16.gmra.mrb[56].mxu1 %v2737_v46 }
 0x628   : > { %v3891_v55 = vpop.f32.mrb[125].mxu1  ;;  %2938 = vmatprep.mubr.bf16.mxu1 %v4747_v6  ;;  %v4424_v6 = vld [vmem:[%s5788_s4 + $0x1f8] sm:$0xff]  }
 0x629   : > { %v3892_v0 = vadd.f32 %v3891_v55, %v3890_v45  ;;  %v3893_v7 = vpop.f32.mrb[126].mxu1  ;;  %3910 = vmatprep.subr.bf16.mxu0 %v4424_v6 }
 0x62a   : > { %v3894_v8 = vpop.f32.mrb[127].mxu1  ;;  %3911 = vmatpush3.bf16.msra.mxu0 %v4425_v53 }
 0x62b   : > { %v3895_v9 = vadd.f32 %v3894_v8, %v3893_v7 }
 0x62d   : > { %v2738_v10 = vpack.c.bf16 %v3895_v9, %v3892_v0 }
 0x62f   : > { %2939 = vmatmul.mubr.bf16.gmra.mrb[60].mxu1 %v2738_v10 }
 0x6ca   : > { %v2870_v58 = vpop.f32.mrb[32].mxu1 }
 0x6cb   : > { %v4056_v59 = vadd.f32 %v2870_v58, %v5674_v57  ;;  %v2872_v52 = vpop.f32.mrb[33].mxu1 }
 0x6cc   : > { %v4057_v60 = vadd.f32 %v2872_v52, %v5677_v51  ;;  %v2874_v61 = vpop.f32.mrb[34].mxu1 }
 0x6cd   : > { %4618 = vtanh.f32 %v4056_v59  ;;  %v4058_v62 = vadd.f32 %v2874_v61, %v5674_v57  ;;  %v2876_v63 = vpop.f32.mrb[35].mxu1 }
 0x6ce   : > { %4620 = vtanh.f32 %v4057_v60  ;;  %v4059_v47 = vadd.f32 %v2876_v63, %v5677_v51 }
 0x6cf   : > { %4622 = vtanh.f32 %v4058_v62 }
 0x6d0   : > { %4624 = vtanh.f32 %v4059_v47 }
 0x6d2   : > { %v2880_v1 = vpop.f32.mrb[36].mxu1 }
 0x6d3   : > { %v4060_v36 = vadd.f32 %v2880_v1, %v5674_v57  ;;  %v2882_v2 = vpop.f32.mrb[37].mxu1 }
 0x6d4   : > { %v4061_v3 = vadd.f32 %v2882_v2, %v5677_v51  ;;  %v2884_v4 = vpop.f32.mrb[38].mxu1 }
 0x6d5   : > { %4626 = vtanh.f32 %v4060_v36  ;;  %v4062_v5 = vadd.f32 %v2884_v4, %v5674_v57  ;;  %v2886_v11 = vpop.f32.mrb[39].mxu1 }
 0x6d6   : > { %4628 = vtanh.f32 %v4061_v3  ;;  %v4063_v12 = vadd.f32 %v2886_v11, %v5677_v51 }
 0x6d7   : > { %v4619_v13 = vpop.eup %4618  ;;  %4630 = vtanh.f32 %v4062_v5 }
 0x6d8   : > { %v4621_v14 = vpop.eup %4620  ;;  %4632 = vtanh.f32 %v4063_v12 }
 0x6d9   : > { %v4623_v15 = vpop.eup %4622 }
 0x6da   : > { %v4625_v16 = vpop.eup %4624  ;;  %v2890_v19 = vpop.f32.mrb[40].mxu1  ;;  %v3013_v20 = vpack.c.bf16 %v4623_v15, %v4619_v13 }
 0x6db   : > { %v4064_v17 = vadd.f32 %v2890_v19, %v5674_v57  ;;  %v2892_v21 = vpop.f32.mrb[41].mxu1  ;;  %v3014_v22 = vpack.c.bf16 %v4625_v16, %v4621_v14 }
 0x6dc   : > { %v4065_v18 = vadd.f32 %v2892_v21, %v5677_v51  ;;  %v2894_v23 = vpop.f32.mrb[42].mxu1 }
 0x6dd   : > { %4634 = vtanh.f32 %v4064_v17  ;;  %v4066_v24 = vadd.f32 %v2894_v23, %v5674_v57  ;;  %v2896_v25 = vpop.f32.mrb[43].mxu1  ;;  %3190 = vmatprep.mubr.bf16.mxu0 %v3014_v22 }
 0x6de   : > { %4636 = vtanh.f32 %v4065_v18  ;;  %v4067_v26 = vadd.f32 %v2896_v25, %v5677_v51  ;;  %3191 = vmatmul.mubr.bf16.vlgmr.msra.gmra.mrb[96].mxu0 %v3013_v20 }
 0x6df   : > { %v4627_v27 = vpop.eup %4626  ;;  %4638 = vtanh.f32 %v4066_v24 }
 0x6e0   : > { %v4629_v49 = vpop.eup %4628  ;;  %4640 = vtanh.f32 %v4067_v26 }
 0x6e1   : > { %v4631_v28 = vpop.eup %4630 }
 0x6e2   : > { %v4633_v29 = vpop.eup %4632  ;;  %v2900_v30 = vpop.f32.mrb[44].mxu1  ;;  %v3015_v31 = vpack.c.bf16 %v4631_v28, %v4627_v27 }
 0x6e3   : > { %v4068_v32 = vadd.f32 %v2900_v30, %v5674_v57  ;;  %v2902_v33 = vpop.f32.mrb[45].mxu1  ;;  %v3016_v34 = vpack.c.bf16 %v4633_v29, %v4629_v49 }
 0x6e4   : > { %v4069_v35 = vadd.f32 %v2902_v33, %v5677_v51  ;;  %v2904_v40 = vpop.f32.mrb[46].mxu1 }
 0x6e5   : > { %4642 = vtanh.f32 %v4068_v32  ;;  %v4070_v41 = vadd.f32 %v2904_v40, %v5674_v57  ;;  %v2906_v37 = vpop.f32.mrb[47].mxu1  ;;  %3198 = vmatprep.mubr.bf16.mxu0 %v3016_v34 }
 0x6e6   : > { %4644 = vtanh.f32 %v4069_v35  ;;  %v4071_v42 = vadd.f32 %v2906_v37, %v5677_v51  ;;  %3199 = vmatmul.mubr.bf16.gmra.mrb[100].mxu0 %v3015_v31 }
 0x6e7   : > { %v4635_v38 = vpop.eup %4634  ;;  %4646 = vtanh.f32 %v4070_v41 }
 0x6e8   : > { %v4637_v43 = vpop.eup %4636  ;;  %4648 = vtanh.f32 %v4071_v42 }
 0x6e9   : > { %v4639_v44 = vpop.eup %4638 }
 0x6ea   : > { %v4641_v39 = vpop.eup %4640  ;;  %v2910_v46 = vpop.f32.mrb[48].mxu1  ;;  %v3017_v45 = vpack.c.bf16 %v4639_v44, %v4635_v38 }
 0x6eb   : > { %v4072_v55 = vadd.f32 %v2910_v46, %v5674_v57  ;;  %v2912_v0 = vpop.f32.mrb[49].mxu1  ;;  %v3018_v7 = vpack.c.bf16 %v4641_v39, %v4637_v43 }
 0x6ec   : > { %v4073_v8 = vadd.f32 %v2912_v0, %v5677_v51  ;;  %v2914_v9 = vpop.f32.mrb[50].mxu1 }
 0x6ed   : > { %4650 = vtanh.f32 %v4072_v55  ;;  %v4074_v10 = vadd.f32 %v2914_v9, %v5674_v57  ;;  %v2916_v48 = vpop.f32.mrb[51].mxu1  ;;  %3206 = vmatprep.mubr.bf16.mxu0 %v3018_v7 }
 0x6ee   : > { %4652 = vtanh.f32 %v4073_v8  ;;  %v4075_v50 = vadd.f32 %v2916_v48, %v5677_v51  ;;  %3207 = vmatmul.mubr.bf16.gmra.mrb[104].mxu0 %v3017_v45 }
 0x6ef   : > { %v4643_v6 = vpop.eup %4642  ;;  %4654 = vtanh.f32 %v4074_v10 }
 0x6f0   : > { %v4645_v53 = vpop.eup %4644  ;;  %4656 = vtanh.f32 %v4075_v50 }
 0x6f1   : > { %v4647_v54 = vpop.eup %4646 }
 0x6f2   : > { %v4649_v56 = vpop.eup %4648  ;;  %v2920_v58 = vpop.f32.mrb[52].mxu1  ;;  %v3019_v59 = vpack.c.bf16 %v4647_v54, %v4643_v6 }
 0x6f3   : > { %v4076_v52 = vadd.f32 %v2920_v58, %v5674_v57  ;;  %v2922_v60 = vpop.f32.mrb[53].mxu1  ;;  %v3020_v61 = vpack.c.bf16 %v4649_v56, %v4645_v53 }
 0x6f4   : > { %v4077_v62 = vadd.f32 %v2922_v60, %v5677_v51  ;;  %v2924_v63 = vpop.f32.mrb[54].mxu1 }
 0x6f5   : > { %4658 = vtanh.f32 %v4076_v52  ;;  %v4078_v47 = vadd.f32 %v2924_v63, %v5674_v57  ;;  %v2926_v1 = vpop.f32.mrb[55].mxu1  ;;  %3214 = vmatprep.mubr.bf16.mxu0 %v3020_v61 }
 0x6f6   : > { %4660 = vtanh.f32 %v4077_v62  ;;  %v4079_v36 = vadd.f32 %v2926_v1, %v5677_v51  ;;  %3215 = vmatmul.mubr.bf16.gmra.mrb[108].mxu0 %v3019_v59 }
 0x6f7   : > { %v4651_v2 = vpop.eup %4650  ;;  %4662 = vtanh.f32 %v4078_v47 }
 0x6f8   : > { %v4653_v3 = vpop.eup %4652  ;;  %4664 = vtanh.f32 %v4079_v36 }
 0x6f9   : > { %v4655_v4 = vpop.eup %4654 }
 0x6fa   : > { %v4657_v5 = vpop.eup %4656  ;;  %v2930_v11 = vpop.f32.mrb[56].mxu1  ;;  %v3021_v12 = vpack.c.bf16 %v4655_v4, %v4651_v2 }
 0x6fb   : > { %v4080_v13 = vadd.f32 %v2930_v11, %v5674_v57  ;;  %v2932_v14 = vpop.f32.mrb[57].mxu1  ;;  %v3022_v15 = vpack.c.bf16 %v4657_v5, %v4653_v3 }
 0x6fc   : > { %v4081_v16 = vadd.f32 %v2932_v14, %v5677_v51  ;;  %v2934_v19 = vpop.f32.mrb[58].mxu1 }
 0x6fd   : > { %4666 = vtanh.f32 %v4080_v13  ;;  %v4082_v20 = vadd.f32 %v2934_v19, %v5674_v57  ;;  %v2936_v17 = vpop.f32.mrb[59].mxu1  ;;  %3222 = vmatprep.mubr.bf16.mxu0 %v3022_v15 }
 0x6fe   : > { %4668 = vtanh.f32 %v4081_v16  ;;  %v4083_v21 = vadd.f32 %v2936_v17, %v5677_v51  ;;  %3223 = vmatmul.mubr.bf16.gmra.mrb[112].mxu0 %v3021_v12 }
 0x6ff   : > { %v4659_v22 = vpop.eup %4658  ;;  %4670 = vtanh.f32 %v4082_v20 }
 0x700   : > { %v4661_v18 = vpop.eup %4660  ;;  %4672 = vtanh.f32 %v4083_v21 }
 0x701   : > { %v4663_v23 = vpop.eup %4662 }
 0x702   : > { %v4665_v24 = vpop.eup %4664  ;;  %v2940_v25 = vpop.f32.mrb[60].mxu1  ;;  %v3023_v26 = vpack.c.bf16 %v4663_v23, %v4659_v22 }
 0x703   : > { %v4084_v27 = vadd.f32 %v2940_v25, %v5674_v57  ;;  %v2942_v49 = vpop.f32.mrb[61].mxu1  ;;  %v3024_v28 = vpack.c.bf16 %v4665_v24, %v4661_v18 }
 0x704   : > { %v4085_v29 = vadd.f32 %v2942_v49, %v5677_v51  ;;  %v2944_v30 = vpop.f32.mrb[62].mxu1 }
 0x705   : > { %4674 = vtanh.f32 %v4084_v27  ;;  %v4086_v31 = vadd.f32 %v2944_v30, %v5674_v57  ;;  %v2946_v32 = vpop.f32.mrb[63].mxu1  ;;  %3230 = vmatprep.mubr.bf16.mxu0 %v3024_v28 }
 0x706   : > { %4676 = vtanh.f32 %v4085_v29  ;;  %v4087_v33 = vadd.f32 %v2946_v32, %v5677_v51  ;;  %3231 = vmatmul.mubr.bf16.gmra.mrb[116].mxu0 %v3023_v26 }
 0x707   : > { %v4667_v34 = vpop.eup %4666  ;;  %4678 = vtanh.f32 %v4086_v31 }
 0x708   : > { %v4669_v35 = vpop.eup %4668  ;;  %4680 = vtanh.f32 %v4087_v33 }
 0x709   : > { %v4671_v40 = vpop.eup %4670 }
 0x70a   : > { %v4673_v41 = vpop.eup %4672  ;;  %v3025_v37 = vpack.c.bf16 %v4671_v40, %v4667_v34 }
 0x70b   : > { %v3026_v42 = vpack.c.bf16 %v4673_v41, %v4669_v35 }
 0x70d   : > { %3238 = vmatprep.mubr.bf16.mxu0 %v3026_v42 }
 0x70e   : > { %3239 = vmatmul.mubr.bf16.gmra.mrb[120].mxu0 %v3025_v37 }
 0x70f   : > { %v4675_v38 = vpop.eup %4674 }
 0x710   : > { %v4677_v57 = vpop.eup %4676 }
 0x711   : > { %v4679_v43 = vpop.eup %4678 }
 0x712   : > { %v4681_v44 = vpop.eup %4680  ;;  %v3027_v39 = vpack.c.bf16 %v4679_v43, %v4675_v38 }
 0x713   : > { %v3028_v46 = vpack.c.bf16 %v4681_v44, %v4677_v57 }
 0x715   : > { %3246 = vmatprep.mubr.bf16.mxu0 %v3028_v46 }
 0x716   : > { %3247 = vmatmul.mubr.bf16.gmra.mrb[124].mxu0 %v3027_v39 }
 0x7b1   : > { %v3912_v51 = vpop.f32.mrb[96].mxu0 }
 0x7b2   : > { %v3913_v45 = vpop.f32.mrb[97].mxu0 }
 0x7b3   : > { %v3914_v55 = vadd.f32 %v3913_v45, %v3912_v51  ;;  %v3915_v0 = vpop.f32.mrb[98].mxu0 }
 0x7b4   : > { %v3916_v7 = vpop.f32.mrb[99].mxu0 }
 0x7b5   : > { %3255 = vst [vmem:[%s5714_s25] sm:$0xff] %v3914_v55  ;;  %v3917_v8 = vadd.f32 %v3916_v7, %v3915_v0 }
 0x7b7   : > { %3256 = vst [vmem:[%s5714_s25 + $0x8] sm:$0xff] %v3917_v8 }
 0x7b9   : > { %v3918_v9 = vpop.f32.mrb[100].mxu0 }
 0x7ba   : > { %v3919_v10 = vpop.f32.mrb[101].mxu0 }
 0x7bb   : > { %v3920_v48 = vadd.f32 %v3919_v10, %v3918_v9  ;;  %v3921_v50 = vpop.f32.mrb[102].mxu0 }
 0x7bc   : > { %v3922_v6 = vpop.f32.mrb[103].mxu0 }
 0x7bd   : > { %3257 = vst [vmem:[%s5714_s25 + $0x10] sm:$0xff] %v3920_v48  ;;  %v3923_v53 = vadd.f32 %v3922_v6, %v3921_v50 }
 0x7bf   : > { %3258 = vst [vmem:[%s5714_s25 + $0x18] sm:$0xff] %v3923_v53 }
 0x7c1   : > { %v3924_v54 = vpop.f32.mrb[104].mxu0 }
 0x7c2   : > { %v3925_v56 = vpop.f32.mrb[105].mxu0 }
 0x7c3   : > { %v3926_v58 = vadd.f32 %v3925_v56, %v3924_v54  ;;  %v3927_v59 = vpop.f32.mrb[106].mxu0 }
 0x7c4   : > { %v3928_v52 = vpop.f32.mrb[107].mxu0 }
 0x7c5   : > { %3259 = vst [vmem:[%s5714_s25 + $0x20] sm:$0xff] %v3926_v58  ;;  %v3929_v60 = vadd.f32 %v3928_v52, %v3927_v59 }
 0x7c7   : > { %3260 = vst [vmem:[%s5714_s25 + $0x28] sm:$0xff] %v3929_v60 }
 0x7c9   : > { %v3930_v61 = vpop.f32.mrb[108].mxu0 }
 0x7ca   : > { %v3931_v62 = vpop.f32.mrb[109].mxu0 }
 0x7cb   : > { %v3932_v63 = vadd.f32 %v3931_v62, %v3930_v61  ;;  %v3933_v47 = vpop.f32.mrb[110].mxu0 }
 0x7cc   : > { %v3934_v1 = vpop.f32.mrb[111].mxu0 }
 0x7cd   : > { %3261 = vst [vmem:[%s5714_s25 + $0x30] sm:$0xff] %v3932_v63  ;;  %v3935_v36 = vadd.f32 %v3934_v1, %v3933_v47 }
 0x7cf   : > { %3262 = vst [vmem:[%s5714_s25 + $0x38] sm:$0xff] %v3935_v36 }
 0x7d1   : > { %v3936_v2 = vpop.f32.mrb[112].mxu0 }
 0x7d2   : > { %v3937_v3 = vpop.f32.mrb[113].mxu0 }
 0x7d3   : > { %v3938_v4 = vadd.f32 %v3937_v3, %v3936_v2  ;;  %v3939_v5 = vpop.f32.mrb[114].mxu0 }
 0x7d4   : > { %v3940_v11 = vpop.f32.mrb[115].mxu0 }
 0x7d5   : > { %3263 = vst [vmem:[%s5714_s25 + $0x40] sm:$0xff] %v3938_v4  ;;  %v3941_v12 = vadd.f32 %v3940_v11, %v3939_v5 }
 0x7d7   : > { %3264 = vst [vmem:[%s5714_s25 + $0x48] sm:$0xff] %v3941_v12 }
 0x7d9   : > { %v3942_v13 = vpop.f32.mrb[116].mxu0 }
 0x7da   : > { %v3943_v14 = vpop.f32.mrb[117].mxu0 }
 0x7db   : > { %v3944_v15 = vadd.f32 %v3943_v14, %v3942_v13  ;;  %v3945_v16 = vpop.f32.mrb[118].mxu0 }
 0x7dc   : > { %v3946_v19 = vpop.f32.mrb[119].mxu0 }
 0x7dd   : > { %3265 = vst [vmem:[%s5714_s25 + $0x50] sm:$0xff] %v3944_v15  ;;  %v3947_v20 = vadd.f32 %v3946_v19, %v3945_v16 }
 0x7df   : > { %3266 = vst [vmem:[%s5714_s25 + $0x58] sm:$0xff] %v3947_v20 }
 0x7e1   : > { %v3948_v17 = vpop.f32.mrb[120].mxu0 }
 0x7e2   : > { %v3949_v21 = vpop.f32.mrb[121].mxu0 }
 0x7e3   : > { %v3950_v22 = vadd.f32 %v3949_v21, %v3948_v17  ;;  %v3951_v18 = vpop.f32.mrb[122].mxu0 }
 0x7e4   : > { %v3952_v23 = vpop.f32.mrb[123].mxu0 }
 0x7e5   : > { %3267 = vst [vmem:[%s5714_s25 + $0x60] sm:$0xff] %v3950_v22  ;;  %v3953_v24 = vadd.f32 %v3952_v23, %v3951_v18 }
 0x7e7   : > { %3268 = vst [vmem:[%s5714_s25 + $0x68] sm:$0xff] %v3953_v24 }
 0x7e9   : > { %v3954_v25 = vpop.f32.mrb[124].mxu0 }
 0x7ea   : > { %v3955_v26 = vpop.f32.mrb[125].mxu0 }
 0x7eb   : > { %v3956_v27 = vadd.f32 %v3955_v26, %v3954_v25  ;;  %v3957_v49 = vpop.f32.mrb[126].mxu0 }
 0x7ec   : > { %v3958_v28 = vpop.f32.mrb[127].mxu0 }
 0x7ed   : > { %3269 = vst [vmem:[%s5714_s25 + $0x70] sm:$0xff] %v3956_v27  ;;  %v3959_v29 = vadd.f32 %v3958_v28, %v3957_v49 }
 0x7ef   : > { %3270 = vst [vmem:[%s5714_s25 + $0x78] sm:$0xff] %v3959_v29 }
 0x7f0   : > { %4696 = shalt.err (!%p4693_p3)
}
 0x7f1   : > { %s4697_s13 = scalar_lea.hbm %s5735_s7, 2048  ;;  %s4701_s16 = scalar_lea.hbm %s5789_s5, 4096 }
 0x7f2   : > { %p4698_p4 = scmp.ne.s32.totalorder %s5735_s7, %s4697_s13  ;;  %p4702_p9 = scmp.lt.u32.totalorder %s5735_s7, %s5789_s5 }
 0x7f3   : > { %p4703_p10 = scmp.lt.u32.totalorder %s4701_s16, %s4697_s13  ;;  %p4705_p12 = scmp.lt.u32.totalorder %s4697_s13, %s5735_s7 }
 0x7f4   : > { %p4699_p7 = pnand %p4698_p4, %p4819_p5 }
 0x7f5   : > { %p4704_p11 = por %p4703_p10, %p4702_p9 }
 0x7f6   : > { %p4700_p8 = pneg %p4699_p7 }
 0x7f7   : > { %p4706_p13 = por %p4705_p12, %p4704_p11 }
 0x7f9   : > { %p4707_p0 = pnand %p4706_p13, %p4700_p8 }
 0x7fb   : > { %4710 = shalt.err (!%p4707_p0)
}
 0x7fc   : > { %s4749_s25 = smov 128   ;;  %s4750_s26 = smov 8  }
 0x7fd   : > { %4216 = dma.vmem_to_hbm [thread:$0]  (%p4819_p5), %s5737_s9, 2048, %s5735_s7, %s5743_s22, %s4749_s25, %s4749_s25, %s4750_s26  }
 0x7fe PF: > { %p4222_p1 = scmp.ge.s32.totalorder %s4745_s21, 2  ;;  %s3300_s30 = sand.u32 1, %s4733_s18  }
 0x7ff   : > { %s3301_s6 = scalar_lea.sflag [#allocation3], %s3300_s30 }
 0x800   : > { %p4219_p2 = pnand %p4222_p1, %p4823_p6 }
 0x802   : > { %4728 = dma.done.wait (!%p4219_p2), %s3301_s6, 2048  }
 0x803   : > { %4730 = vsyncadd (!%p4219_p2), %s3301_s6, 4294965248  ;;  %p15_p3 = scmp.ge.s32.totalorder %s4806_s24, 4   ;;  %s5792_s18 = smov %s4737_s19 }
 0x804   : > { %s5793_s19 = smov %s4741_s20  ;;  %s5794_s20 = smov %s4817_s27 }
 0x805   : > { %s5795_s21 = smov %s4806_s24  ;;  %17 = sbr.rel (!%p15_p3) target bundleno = 3 (0x3), region = 81 }
 0x80c   :  { %3306 = vsyncpa [#allocation3], 1 }
 0x80d   :  { %3308 = vsyncpa [#allocation3 + $0x1], 1 }

</bundles_post_ra>
